<compile_context>
chip_gen: v7x
topology: tpu7x:2x2x1
jax: 0.10.0
libtpu: 0.0.40
codegen_flags: <defaults>
</compile_context>

<pallas_src>
import functools

import jax
import jax.numpy as jnp
from jax import lax
from jax.experimental import pallas as pl
from jax.experimental.pallas import tpu as pltpu

_BN_EPS = 1e-5
_PAD = 8  # left/right column halo (one f32 sublane tile) -> aligned scratch stores


# ---------------------------------------------------------------------------
# Fused Bottleneck kernel
# ---------------------------------------------------------------------------

def _bottleneck_kernel(x_ref, xt_ref, xb_ref,
                       w1_ref, b1_ref, w2_ref, b2_ref, w3_ref, b3_ref,
                       o_ref, y1_ref, *, th, w, planes):
    """One (image, row-tile) step of the fused Bottleneck.

    x_ref : (1, th, w, cin)        f32 input rows (also the residual)
    xt_ref: (1, 1, w, cin)         row above the tile (clamped; masked at edge)
    xb_ref: (1, 1, w, cin)         row below the tile (clamped; masked at edge)
    w1_ref: (cin, planes)          bf16, bn1 scale folded in
    w2_ref: (9, planes, planes)    bf16, bn2 scale folded in, taps [ky*3+kx]
    w3_ref: (planes, cout)         bf16, bn3 scale folded in
    b*_ref: (1, C)                 f32 folded BN biases
    o_ref : (1, th, w, cout)       f32 output rows
    y1_ref: (th+2, w+2*_PAD, planes) f32 scratch: y1 with a zero halo
    """
    cin = x_ref.shape[-1]
    cout = o_ref.shape[-1]
    i = pl.program_id(1)
    last = pl.num_programs(1) - 1

    w1 = w1_ref[...]                               # (cin, planes) bf16
    b1 = b1_ref[...]                               # (1, planes)   f32

    def conv1(rows):                               # (m, cin) f32 -> (m, planes) f32
        y = jnp.dot(rows.astype(jnp.bfloat16), w1,
                    preferred_element_type=jnp.float32)
        return jnp.maximum(y + b1, 0.0)

    # ---- stage 1: 1x1 conv + bn1 + relu, written into the halo'd scratch ----
    y1_ref[...] = jnp.zeros((th + 2, w + 2 * _PAD, planes), jnp.float32)
    x_mid = x_ref[0].reshape(th * w, cin)          # f32, reused as the residual
    y1_ref[1:th + 1, _PAD:_PAD + w, :] = conv1(x_mid).reshape(th, w, planes)

    top_ok = (i > 0).astype(jnp.float32)           # halo rows outside the image
    bot_ok = (i < last).astype(jnp.float32)        # are the conv2 zero padding
    y1_ref[0, _PAD:_PAD + w, :] = conv1(xt_ref[0, 0]) * top_ok
    y1_ref[th + 1, _PAD:_PAD + w, :] = conv1(xb_ref[0, 0]) * bot_ok

    # ---- stage 2: 3x3 / stride-1 / pad-1 conv + bn2 + relu ------------------
    acc = jnp.zeros((th * w, planes), jnp.float32)
    for ky in range(3):
        slab = y1_ref[ky:ky + th]                  # (th, w + 2*_PAD, planes) f32
        for kx in range(3):
            c0 = _PAD - 1 + kx
            tap = slab[:, c0:c0 + w, :]            # (th, w, planes)
            acc = acc + jnp.dot(
                tap.reshape(th * w, planes).astype(jnp.bfloat16),
                w2_ref[ky * 3 + kx],
                preferred_element_type=jnp.float32)
    y2 = jnp.maximum(acc + b2_ref[...], 0.0).astype(jnp.bfloat16)

    # ---- stage 3: 1x1 conv + bn3 + residual add + relu ----------------------
    y3 = jnp.dot(y2, w3_ref[...], preferred_element_type=jnp.float32)
    y3 = y3 + b3_ref[...] + x_mid
    o_ref[...] = jnp.maximum(y3, 0.0).reshape(1, th, w, cout).astype(o_ref.dtype)


# ---------------------------------------------------------------------------
# Wrapper
# ---------------------------------------------------------------------------

def _fold_bn(bn, eps=_BN_EPS):
    s = bn["gamma"] / jnp.sqrt(bn["var"] + eps)
    b = bn["beta"] - bn["mean"] * s
    return s.astype(jnp.float32), b.astype(jnp.float32)


def _pick_row_tile(h, w, cin, planes, weight_bytes, budget=20 * 1024 * 1024):
    """Largest divisor of h whose per-step VMEM estimate fits the budget,
    preferring >= 2 row tiles so the pipeline / megacore have work."""
    cout = cin

    def est(th):
        io = 2 * 4 * (th * w * cin + 2 * w * cin + th * w * cout)  # dbl-buffered blocks
        scratch = (th + 2) * (w + 2 * _PAD) * planes * 4
        temps = 4 * th * w * (cin + cout + 6 * planes)             # live values (rough)
        return io + scratch + temps + 2 * weight_bytes             # weights dbl-buffered

    divs = sorted((d for d in range(1, h + 1) if h % d == 0), reverse=True)
    for d in divs:                       # prefer at least 2 tiles along h
        if d < h and est(d) <= budget:
            return d
    for d in divs:
        if est(d) <= budget:
            return d
    return 1  # TODO(synk): tile along w as well for very large feature maps


def bottleneck_forward(x, params):
    """x: (N, inplanes, H, W) NCHW f32.  stride=1, downsample=None path."""
    n, cin, h, w = x.shape
    planes = params["w1"].shape[1]
    cout = 4 * planes
    assert cin == cout, "identity residual requires inplanes == planes * 4"

    s1, b1 = _fold_bn(params["bn1"])
    s2, b2 = _fold_bn(params["bn2"])
    s3, b3 = _fold_bn(params["bn3"])

    # BN scale folded into the conv weights; bf16 weights for the native MXU path.
    w1 = (params["w1"].astype(jnp.float32) * s1[None, :]).astype(jnp.bfloat16)
    w2 = (params["w2"].astype(jnp.float32) * s2[None, None, None, :])
    w2 = w2.reshape(9, planes, planes).astype(jnp.bfloat16)        # [ky*3+kx, ci, co]
    w3 = (params["w3"].astype(jnp.float32) * s3[None, :]).astype(jnp.bfloat16)
    b1 = b1.reshape(1, planes)
    b2 = b2.reshape(1, planes)
    b3 = b3.reshape(1, cout)

    x_nhwc = jnp.transpose(x, (0, 2, 3, 1))                        # channels-last

    wbytes = 2 * (w1.size + w2.size + w3.size)
    th = _pick_row_tile(h, w, cin, planes, wbytes)
    nh = h // th

    kernel = functools.partial(_bottleneck_kernel, th=th, w=w, planes=planes)

    in_specs = [
        pl.BlockSpec((1, th, w, cin), lambda b, i: (b, i, 0, 0)),
        pl.BlockSpec((1, 1, w, cin),
                     lambda b, i: (b, jnp.maximum(i * th - 1, 0), 0, 0)),
        pl.BlockSpec((1, 1, w, cin),
                     lambda b, i: (b, jnp.minimum((i + 1) * th, h - 1), 0, 0)),
        pl.BlockSpec((cin, planes), lambda b, i: (0, 0)),
        pl.BlockSpec((1, planes), lambda b, i: (0, 0)),
        pl.BlockSpec((9, planes, planes), lambda b, i: (0, 0, 0)),
        pl.BlockSpec((1, planes), lambda b, i: (0, 0)),
        pl.BlockSpec((planes, cout), lambda b, i: (0, 0)),
        pl.BlockSpec((1, cout), lambda b, i: (0, 0)),
    ]

    out = pl.pallas_call(
        kernel,
        out_shape=jax.ShapeDtypeStruct((n, h, w, cout), x.dtype),
        grid_spec=pltpu.PrefetchScalarGridSpec(
            num_scalar_prefetch=0,
            grid=(n, nh),
            in_specs=in_specs,
            out_specs=pl.BlockSpec((1, th, w, cout), lambda b, i: (b, i, 0, 0)),
            scratch_shapes=[
                pltpu.VMEM((th + 2, w + 2 * _PAD, planes), jnp.float32)]),
        compiler_params=pltpu.CompilerParams(
            dimension_semantics=("parallel", "parallel"),
            vmem_limit_bytes=32 * 1024 * 1024),
    )(x_nhwc, x_nhwc, x_nhwc, w1, b1, w2, b2, w3, b3)

    return jnp.transpose(out, (0, 3, 1, 2))


# ---------------------------------------------------------------------------
# Test
# ---------------------------------------------------------------------------

if __name__ == "__main__":
    key = jax.random.PRNGKey(0)
    n, inplanes, planes, h, w = 2, 32, 8, 16, 16
    keys = jax.random.split(key, 8)

    def bn_params(k, c):
        k1, k2, k3, k4 = jax.random.split(k, 4)
        return {
            "gamma": 1.0 + 0.1 * jax.random.normal(k1, (c,), jnp.float32),
            "beta": 0.1 * jax.random.normal(k2, (c,), jnp.float32),
            "mean": 0.1 * jax.random.normal(k3, (c,), jnp.float32),
            "var": 0.5 + jax.random.uniform(k4, (c,), jnp.float32),
        }

    params = {
        "w1": 0.1 * jax.random.normal(keys[0], (inplanes, planes), jnp.float32),
        "bn1": bn_params(keys[1], planes),
        "w2": 0.1 * jax.random.normal(keys[2], (3, 3, planes, planes), jnp.float32),
        "bn2": bn_params(keys[3], planes),
        "w3": 0.1 * jax.random.normal(keys[4], (planes, 4 * planes), jnp.float32),
        "bn3": bn_params(keys[5], 4 * planes),
    }
    x = jax.random.normal(keys[6], (n, inplanes, h, w), jnp.float32)

    y = jax.block_until_ready(bottleneck_forward(x, params))

    # Plain-JAX f32 reference (PyTorch Bottleneck in eval mode).
    def bn_ref(t, p, eps=_BN_EPS):
        s = p["gamma"] / jnp.sqrt(p["var"] + eps)
        b = p["beta"] - p["mean"] * s
        return t * s[None, :, None, None] + b[None, :, None, None]

    dn = ("NCHW", "OIHW", "NCHW")
    hp = lax.Precision.HIGHEST
    w1r = params["w1"].T[:, :, None, None]
    w2r = jnp.transpose(params["w2"], (3, 2, 0, 1))
    w3r = params["w3"].T[:, :, None, None]
    r = lax.conv_general_dilated(x, w1r, (1, 1), "VALID",
                                 dimension_numbers=dn, precision=hp)
    r = jax.nn.relu(bn_ref(r, params["bn1"]))
    r = lax.conv_general_dilated(r, w2r, (1, 1), ((1, 1), (1, 1)),
                                 dimension_numbers=dn, precision=hp)
    r = jax.nn.relu(bn_ref(r, params["bn2"]))
    r = lax.conv_general_dilated(r, w3r, (1, 1), "VALID",
                                 dimension_numbers=dn, precision=hp)
    r = jax.nn.relu(bn_ref(r, params["bn3"]) + x)

    assert y.shape == (n, 4 * planes, h, w)
    max_err = float(jnp.max(jnp.abs(y - r)))
    # bf16 MXU path vs f32 reference: tolerance loosened accordingly.
    assert jnp.allclose(y, r, rtol=4e-2, atol=4e-2), max_err

    print("KERNEL_OK")
</pallas_src>

<mosaic_0001>
module attributes {stable_mosaic.version = 11 : i64} {
  func.func @_bottleneck_kernel(%arg0: i32, %arg1: i32, %arg2: memref<1x8x16x32xf32, #tpu.memory_space<vmem>>, %arg3: memref<1x1x16x32xf32, #tpu.memory_space<vmem>>, %arg4: memref<1x1x16x32xf32, #tpu.memory_space<vmem>>, %arg5: memref<32x8xbf16, #tpu.memory_space<vmem>>, %arg6: memref<1x8xf32, #tpu.memory_space<vmem>>, %arg7: memref<9x8x8xbf16, #tpu.memory_space<vmem>>, %arg8: memref<1x8xf32, #tpu.memory_space<vmem>>, %arg9: memref<8x32xbf16, #tpu.memory_space<vmem>>, %arg10: memref<1x32xf32, #tpu.memory_space<vmem>>, %arg11: memref<1x8x16x32xf32, #tpu.memory_space<vmem>>, %arg12: memref<10x32x8xf32, #tpu.memory_space<vmem>>) attributes {dimension_semantics = [#tpu.dimension_semantics<parallel>, #tpu.dimension_semantics<parallel>], iteration_bounds = array<i64: 2, 2>, scalar_prefetch = 0 : i64, scratch_operands = 1 : i64, tpu.core_type = #tpu.core_type<tc>, window_params = [{transform_indices = @transform_0, window_bounds = array<i64: 1, 8, 16, 32>}, {transform_indices = @transform_1, window_bounds = array<i64: 1, 1, 16, 32>}, {transform_indices = @transform_2, window_bounds = array<i64: 1, 1, 16, 32>}, {pipeline_mode = #tpu.pipeline_mode<synchronous>, transform_indices = @transform_3, window_bounds = array<i64: 32, 8>}, {pipeline_mode = #tpu.pipeline_mode<synchronous>, transform_indices = @transform_4, window_bounds = array<i64: 1, 8>}, {pipeline_mode = #tpu.pipeline_mode<synchronous>, transform_indices = @transform_5, window_bounds = array<i64: 9, 8, 8>}, {pipeline_mode = #tpu.pipeline_mode<synchronous>, transform_indices = @transform_6, window_bounds = array<i64: 1, 8>}, {pipeline_mode = #tpu.pipeline_mode<synchronous>, transform_indices = @transform_7, window_bounds = array<i64: 8, 32>}, {pipeline_mode = #tpu.pipeline_mode<synchronous>, transform_indices = @transform_8, window_bounds = array<i64: 1, 32>}, {transform_indices = @transform_9, window_bounds = array<i64: 1, 8, 16, 32>}]} {
    %c0 = arith.constant 0 : index
    %c0_0 = arith.constant 0 : index
    %0 = vector.load %arg5[%c0, %c0_0] : memref<32x8xbf16, #tpu.memory_space<vmem>>, vector<32x8xbf16>
    %c0_1 = arith.constant 0 : index
    %c0_2 = arith.constant 0 : index
    %1 = vector.load %arg6[%c0_1, %c0_2] : memref<1x8xf32, #tpu.memory_space<vmem>>, vector<1x8xf32>
    %cst = arith.constant 0.000000e+00 : f32
    %2 = vector.broadcast %cst : f32 to vector<10x32x8xf32>
    %c0_3 = arith.constant 0 : index
    %c0_4 = arith.constant 0 : index
    %c0_5 = arith.constant 0 : index
    %3 = vector.load %arg12[%c0_3, %c0_4, %c0_5] : memref<10x32x8xf32, #tpu.memory_space<vmem>>, vector<10x32x8xf32>
    tpu.vector_store %arg12[%c0_3, %c0_4, %c0_5], %2 {strides = array<i32>} : memref<10x32x8xf32, #tpu.memory_space<vmem>>, vector<10x32x8xf32>,
    %c0_6 = arith.constant 0 : index
    %c0_7 = arith.constant 0 : index
    %c0_8 = arith.constant 0 : index
    %c0_9 = arith.constant 0 : index
    %4 = vector.load %arg2[%c0_6, %c0_7, %c0_8, %c0_9] : memref<1x8x16x32xf32, #tpu.memory_space<vmem>>, vector<1x8x16x32xf32>
    %5 = vector.shape_cast %4 : vector<1x8x16x32xf32> to vector<8x16x32xf32>
    %6 = vector.shape_cast %5 : vector<8x16x32xf32> to vector<128x32xf32>
    %7 = arith.truncf %6 : vector<128x32xf32> to vector<128x32xbf16>
    %cst_10 = arith.constant dense<0.000000e+00> : vector<128x8xf32>
    %8 = tpu.matmul %7, %0, %cst_10 {dimension_numbers = #tpu.dot_dimension_numbers<[1], [0], [0], [1], [0, 0, 1, 1], [], []>} : vector<128x32xbf16>, vector<32x8xbf16>, vector<128x8xf32> -> vector<128x8xf32>
    %9 = vector.broadcast %1 : vector<1x8xf32> to vector<128x8xf32>
    %10 = arith.addf %8, %9 : vector<128x8xf32>
    %cst_11 = arith.constant 0.000000e+00 : f32
    %11 = vector.broadcast %cst_11 : f32 to vector<128x8xf32>
    %12 = arith.maximumf %10, %11 : vector<128x8xf32>
    %13 = vector.shape_cast %12 : vector<128x8xf32> to vector<8x16x8xf32>
    %c1 = arith.constant 1 : index
    %c8 = arith.constant 8 : index
    %c0_12 = arith.constant 0 : index
    %14 = vector.load %arg12[%c1, %c8, %c0_12] : memref<10x32x8xf32, #tpu.memory_space<vmem>>, vector<8x16x8xf32>
    tpu.vector_store %arg12[%c1, %c8, %c0_12], %13 {strides = array<i32>} : memref<10x32x8xf32, #tpu.memory_space<vmem>>, vector<8x16x8xf32>,
    %c0_i32 = arith.constant 0 : i32
    %15 = arith.cmpi sgt, %arg1, %c0_i32 : i32
    %16 = arith.extui %15 : i1 to i32
    %17 = arith.sitofp %16 : i32 to f32
    %c1_i32 = arith.constant 1 : i32
    %18 = arith.cmpi slt, %arg1, %c1_i32 : i32
    %19 = arith.extui %18 : i1 to i32
    %20 = arith.sitofp %19 : i32 to f32
    %c0_13 = arith.constant 0 : index
    %c0_14 = arith.constant 0 : index
    %c0_15 = arith.constant 0 : index
    %c0_16 = arith.constant 0 : index
    %21 = vector.load %arg3[%c0_13, %c0_14, %c0_15, %c0_16] : memref<1x1x16x32xf32, #tpu.memory_space<vmem>>, vector<1x1x16x32xf32>
    %22 = vector.shape_cast %21 : vector<1x1x16x32xf32> to vector<16x32xf32>
    %23 = arith.truncf %22 : vector<16x32xf32> to vector<16x32xbf16>
    %cst_17 = arith.constant dense<0.000000e+00> : vector<16x8xf32>
    %24 = tpu.matmul %23, %0, %cst_17 {dimension_numbers = #tpu.dot_dimension_numbers<[1], [0], [0], [1], [0, 0, 1, 1], [], []>} : vector<16x32xbf16>, vector<32x8xbf16>, vector<16x8xf32> -> vector<16x8xf32>
    %25 = vector.broadcast %1 : vector<1x8xf32> to vector<16x8xf32>
    %26 = arith.addf %24, %25 : vector<16x8xf32>
    %cst_18 = arith.constant 0.000000e+00 : f32
    %27 = vector.broadcast %cst_18 : f32 to vector<16x8xf32>
    %28 = arith.maximumf %26, %27 : vector<16x8xf32>
    %29 = vector.broadcast %17 : f32 to vector<16x8xf32>
    %30 = arith.mulf %28, %29 : vector<16x8xf32>
    %c0_19 = arith.constant 0 : index
    %c8_20 = arith.constant 8 : index
    %c0_21 = arith.constant 0 : index
    %31 = vector.load %arg12[%c0_19, %c8_20, %c0_21] : memref<10x32x8xf32, #tpu.memory_space<vmem>>, vector<1x16x8xf32>
    %32 = vector.shape_cast %31 : vector<1x16x8xf32> to vector<16x8xf32>
    %33 = vector.shape_cast %30 : vector<16x8xf32> to vector<1x16x8xf32>
    tpu.vector_store %arg12[%c0_19, %c8_20, %c0_21], %33 {strides = array<i32>} : memref<10x32x8xf32, #tpu.memory_space<vmem>>, vector<1x16x8xf32>,
    %c0_22 = arith.constant 0 : index
    %c0_23 = arith.constant 0 : index
    %c0_24 = arith.constant 0 : index
    %c0_25 = arith.constant 0 : index
    %34 = vector.load %arg4[%c0_22, %c0_23, %c0_24, %c0_25] : memref<1x1x16x32xf32, #tpu.memory_space<vmem>>, vector<1x1x16x32xf32>
    %35 = vector.shape_cast %34 : vector<1x1x16x32xf32> to vector<16x32xf32>
    %36 = arith.truncf %35 : vector<16x32xf32> to vector<16x32xbf16>
    %cst_26 = arith.constant dense<0.000000e+00> : vector<16x8xf32>
    %37 = tpu.matmul %36, %0, %cst_26 {dimension_numbers = #tpu.dot_dimension_numbers<[1], [0], [0], [1], [0, 0, 1, 1], [], []>} : vector<16x32xbf16>, vector<32x8xbf16>, vector<16x8xf32> -> vector<16x8xf32>
    %38 = vector.broadcast %1 : vector<1x8xf32> to vector<16x8xf32>
    %39 = arith.addf %37, %38 : vector<16x8xf32>
    %cst_27 = arith.constant 0.000000e+00 : f32
    %40 = vector.broadcast %cst_27 : f32 to vector<16x8xf32>
    %41 = arith.maximumf %39, %40 : vector<16x8xf32>
    %42 = vector.broadcast %20 : f32 to vector<16x8xf32>
    %43 = arith.mulf %41, %42 : vector<16x8xf32>
    %c9 = arith.constant 9 : index
    %c8_28 = arith.constant 8 : index
    %c0_29 = arith.constant 0 : index
    %44 = vector.load %arg12[%c9, %c8_28, %c0_29] : memref<10x32x8xf32, #tpu.memory_space<vmem>>, vector<1x16x8xf32>
    %45 = vector.shape_cast %44 : vector<1x16x8xf32> to vector<16x8xf32>
    %46 = vector.shape_cast %43 : vector<16x8xf32> to vector<1x16x8xf32>
    tpu.vector_store %arg12[%c9, %c8_28, %c0_29], %46 {strides = array<i32>} : memref<10x32x8xf32, #tpu.memory_space<vmem>>, vector<1x16x8xf32>,
    %cst_30 = arith.constant 0.000000e+00 : f32
    %47 = vector.broadcast %cst_30 : f32 to vector<128x8xf32>
    %c0_31 = arith.constant 0 : index
    %c0_32 = arith.constant 0 : index
    %c0_33 = arith.constant 0 : index
    %48 = vector.load %arg12[%c0_31, %c0_32, %c0_33] : memref<10x32x8xf32, #tpu.memory_space<vmem>>, vector<8x32x8xf32>
    %49 = vector.extract_strided_slice %48 {offsets = [0, 7, 0], sizes = [8, 16, 8], strides = [1, 1, 1]} : vector<8x32x8xf32> to vector<8x16x8xf32>
    %50 = vector.shape_cast %49 : vector<8x16x8xf32> to vector<128x8xf32>
    %51 = arith.truncf %50 : vector<128x8xf32> to vector<128x8xbf16>
    %c0_34 = arith.constant 0 : index
    %c0_35 = arith.constant 0 : index
    %c0_36 = arith.constant 0 : index
    %52 = vector.load %arg7[%c0_34, %c0_35, %c0_36] : memref<9x8x8xbf16, #tpu.memory_space<vmem>>, vector<1x8x8xbf16>
    %53 = vector.shape_cast %52 : vector<1x8x8xbf16> to vector<8x8xbf16>
    %cst_37 = arith.constant dense<0.000000e+00> : vector<128x8xf32>
    %54 = tpu.matmul %51, %53, %cst_37 {dimension_numbers = #tpu.dot_dimension_numbers<[1], [0], [0], [1], [0, 0, 1, 1], [], []>} : vector<128x8xbf16>, vector<8x8xbf16>, vector<128x8xf32> -> vector<128x8xf32>
    %55 = arith.addf %47, %54 : vector<128x8xf32>
    %56 = vector.extract_strided_slice %48 {offsets = [0, 8, 0], sizes = [8, 16, 8], strides = [1, 1, 1]} : vector<8x32x8xf32> to vector<8x16x8xf32>
    %57 = vector.shape_cast %56 : vector<8x16x8xf32> to vector<128x8xf32>
    %58 = arith.truncf %57 : vector<128x8xf32> to vector<128x8xbf16>
    %c1_38 = arith.constant 1 : index
    %c0_39 = arith.constant 0 : index
    %c0_40 = arith.constant 0 : index
    %59 = vector.load %arg7[%c1_38, %c0_39, %c0_40] : memref<9x8x8xbf16, #tpu.memory_space<vmem>>, vector<1x8x8xbf16>
    %60 = vector.shape_cast %59 : vector<1x8x8xbf16> to vector<8x8xbf16>
    %cst_41 = arith.constant dense<0.000000e+00> : vector<128x8xf32>
    %61 = tpu.matmul %58, %60, %cst_41 {dimension_numbers = #tpu.dot_dimension_numbers<[1], [0], [0], [1], [0, 0, 1, 1], [], []>} : vector<128x8xbf16>, vector<8x8xbf16>, vector<128x8xf32> -> vector<128x8xf32>
    %62 = arith.addf %55, %61 : vector<128x8xf32>
    %63 = vector.extract_strided_slice %48 {offsets = [0, 9, 0], sizes = [8, 16, 8], strides = [1, 1, 1]} : vector<8x32x8xf32> to vector<8x16x8xf32>
    %64 = vector.shape_cast %63 : vector<8x16x8xf32> to vector<128x8xf32>
    %65 = arith.truncf %64 : vector<128x8xf32> to vector<128x8xbf16>
    %c2 = arith.constant 2 : index
    %c0_42 = arith.constant 0 : index
    %c0_43 = arith.constant 0 : index
    %66 = vector.load %arg7[%c2, %c0_42, %c0_43] : memref<9x8x8xbf16, #tpu.memory_space<vmem>>, vector<1x8x8xbf16>
    %67 = vector.shape_cast %66 : vector<1x8x8xbf16> to vector<8x8xbf16>
    %cst_44 = arith.constant dense<0.000000e+00> : vector<128x8xf32>
    %68 = tpu.matmul %65, %67, %cst_44 {dimension_numbers = #tpu.dot_dimension_numbers<[1], [0], [0], [1], [0, 0, 1, 1], [], []>} : vector<128x8xbf16>, vector<8x8xbf16>, vector<128x8xf32> -> vector<128x8xf32>
    %69 = arith.addf %62, %68 : vector<128x8xf32>
    %c1_45 = arith.constant 1 : index
    %c0_46 = arith.constant 0 : index
    %c0_47 = arith.constant 0 : index
    %70 = vector.load %arg12[%c1_45, %c0_46, %c0_47] : memref<10x32x8xf32, #tpu.memory_space<vmem>>, vector<8x32x8xf32>
    %71 = vector.extract_strided_slice %70 {offsets = [0, 7, 0], sizes = [8, 16, 8], strides = [1, 1, 1]} : vector<8x32x8xf32> to vector<8x16x8xf32>
    %72 = vector.shape_cast %71 : vector<8x16x8xf32> to vector<128x8xf32>
    %73 = arith.truncf %72 : vector<128x8xf32> to vector<128x8xbf16>
    %c3 = arith.constant 3 : index
    %c0_48 = arith.constant 0 : index
    %c0_49 = arith.constant 0 : index
    %74 = vector.load %arg7[%c3, %c0_48, %c0_49] : memref<9x8x8xbf16, #tpu.memory_space<vmem>>, vector<1x8x8xbf16>
    %75 = vector.shape_cast %74 : vector<1x8x8xbf16> to vector<8x8xbf16>
    %cst_50 = arith.constant dense<0.000000e+00> : vector<128x8xf32>
    %76 = tpu.matmul %73, %75, %cst_50 {dimension_numbers = #tpu.dot_dimension_numbers<[1], [0], [0], [1], [0, 0, 1, 1], [], []>} : vector<128x8xbf16>, vector<8x8xbf16>, vector<128x8xf32> -> vector<128x8xf32>
    %77 = arith.addf %69, %76 : vector<128x8xf32>
    %78 = vector.extract_strided_slice %70 {offsets = [0, 8, 0], sizes = [8, 16, 8], strides = [1, 1, 1]} : vector<8x32x8xf32> to vector<8x16x8xf32>
    %79 = vector.shape_cast %78 : vector<8x16x8xf32> to vector<128x8xf32>
    %80 = arith.truncf %79 : vector<128x8xf32> to vector<128x8xbf16>
    %c4 = arith.constant 4 : index
    %c0_51 = arith.constant 0 : index
    %c0_52 = arith.constant 0 : index
    %81 = vector.load %arg7[%c4, %c0_51, %c0_52] : memref<9x8x8xbf16, #tpu.memory_space<vmem>>, vector<1x8x8xbf16>
    %82 = vector.shape_cast %81 : vector<1x8x8xbf16> to vector<8x8xbf16>
    %cst_53 = arith.constant dense<0.000000e+00> : vector<128x8xf32>
    %83 = tpu.matmul %80, %82, %cst_53 {dimension_numbers = #tpu.dot_dimension_numbers<[1], [0], [0], [1], [0, 0, 1, 1], [], []>} : vector<128x8xbf16>, vector<8x8xbf16>, vector<128x8xf32> -> vector<128x8xf32>
    %84 = arith.addf %77, %83 : vector<128x8xf32>
    %85 = vector.extract_strided_slice %70 {offsets = [0, 9, 0], sizes = [8, 16, 8], strides = [1, 1, 1]} : vector<8x32x8xf32> to vector<8x16x8xf32>
    %86 = vector.shape_cast %85 : vector<8x16x8xf32> to vector<128x8xf32>
    %87 = arith.truncf %86 : vector<128x8xf32> to vector<128x8xbf16>
    %c5 = arith.constant 5 : index
    %c0_54 = arith.constant 0 : index
    %c0_55 = arith.constant 0 : index
    %88 = vector.load %arg7[%c5, %c0_54, %c0_55] : memref<9x8x8xbf16, #tpu.memory_space<vmem>>, vector<1x8x8xbf16>
    %89 = vector.shape_cast %88 : vector<1x8x8xbf16> to vector<8x8xbf16>
    %cst_56 = arith.constant dense<0.000000e+00> : vector<128x8xf32>
    %90 = tpu.matmul %87, %89, %cst_56 {dimension_numbers = #tpu.dot_dimension_numbers<[1], [0], [0], [1], [0, 0, 1, 1], [], []>} : vector<128x8xbf16>, vector<8x8xbf16>, vector<128x8xf32> -> vector<128x8xf32>
    %91 = arith.addf %84, %90 : vector<128x8xf32>
    %c2_57 = arith.constant 2 : index
    %c0_58 = arith.constant 0 : index
    %c0_59 = arith.constant 0 : index
    %92 = vector.load %arg12[%c2_57, %c0_58, %c0_59] : memref<10x32x8xf32, #tpu.memory_space<vmem>>, vector<8x32x8xf32>
    %93 = vector.extract_strided_slice %92 {offsets = [0, 7, 0], sizes = [8, 16, 8], strides = [1, 1, 1]} : vector<8x32x8xf32> to vector<8x16x8xf32>
    %94 = vector.shape_cast %93 : vector<8x16x8xf32> to vector<128x8xf32>
    %95 = arith.truncf %94 : vector<128x8xf32> to vector<128x8xbf16>
    %c6 = arith.constant 6 : index
    %c0_60 = arith.constant 0 : index
    %c0_61 = arith.constant 0 : index
    %96 = vector.load %arg7[%c6, %c0_60, %c0_61] : memref<9x8x8xbf16, #tpu.memory_space<vmem>>, vector<1x8x8xbf16>
    %97 = vector.shape_cast %96 : vector<1x8x8xbf16> to vector<8x8xbf16>
    %cst_62 = arith.constant dense<0.000000e+00> : vector<128x8xf32>
    %98 = tpu.matmul %95, %97, %cst_62 {dimension_numbers = #tpu.dot_dimension_numbers<[1], [0], [0], [1], [0, 0, 1, 1], [], []>} : vector<128x8xbf16>, vector<8x8xbf16>, vector<128x8xf32> -> vector<128x8xf32>
    %99 = arith.addf %91, %98 : vector<128x8xf32>
    %100 = vector.extract_strided_slice %92 {offsets = [0, 8, 0], sizes = [8, 16, 8], strides = [1, 1, 1]} : vector<8x32x8xf32> to vector<8x16x8xf32>
    %101 = vector.shape_cast %100 : vector<8x16x8xf32> to vector<128x8xf32>
    %102 = arith.truncf %101 : vector<128x8xf32> to vector<128x8xbf16>
    %c7 = arith.constant 7 : index
    %c0_63 = arith.constant 0 : index
    %c0_64 = arith.constant 0 : index
    %103 = vector.load %arg7[%c7, %c0_63, %c0_64] : memref<9x8x8xbf16, #tpu.memory_space<vmem>>, vector<1x8x8xbf16>
    %104 = vector.shape_cast %103 : vector<1x8x8xbf16> to vector<8x8xbf16>
    %cst_65 = arith.constant dense<0.000000e+00> : vector<128x8xf32>
    %105 = tpu.matmul %102, %104, %cst_65 {dimension_numbers = #tpu.dot_dimension_numbers<[1], [0], [0], [1], [0, 0, 1, 1], [], []>} : vector<128x8xbf16>, vector<8x8xbf16>, vector<128x8xf32> -> vector<128x8xf32>
    %106 = arith.addf %99, %105 : vector<128x8xf32>
    %107 = vector.extract_strided_slice %92 {offsets = [0, 9, 0], sizes = [8, 16, 8], strides = [1, 1, 1]} : vector<8x32x8xf32> to vector<8x16x8xf32>
    %108 = vector.shape_cast %107 : vector<8x16x8xf32> to vector<128x8xf32>
    %109 = arith.truncf %108 : vector<128x8xf32> to vector<128x8xbf16>
    %c8_66 = arith.constant 8 : index
    %c0_67 = arith.constant 0 : index
    %c0_68 = arith.constant 0 : index
    %110 = vector.load %arg7[%c8_66, %c0_67, %c0_68] : memref<9x8x8xbf16, #tpu.memory_space<vmem>>, vector<1x8x8xbf16>
    %111 = vector.shape_cast %110 : vector<1x8x8xbf16> to vector<8x8xbf16>
    %cst_69 = arith.constant dense<0.000000e+00> : vector<128x8xf32>
    %112 = tpu.matmul %109, %111, %cst_69 {dimension_numbers = #tpu.dot_dimension_numbers<[1], [0], [0], [1], [0, 0, 1, 1], [], []>} : vector<128x8xbf16>, vector<8x8xbf16>, vector<128x8xf32> -> vector<128x8xf32>
    %113 = arith.addf %106, %112 : vector<128x8xf32>
    %c0_70 = arith.constant 0 : index
    %c0_71 = arith.constant 0 : index
    %114 = vector.load %arg8[%c0_70, %c0_71] : memref<1x8xf32, #tpu.memory_space<vmem>>, vector<1x8xf32>
    %115 = vector.broadcast %114 : vector<1x8xf32> to vector<128x8xf32>
    %116 = arith.addf %113, %115 : vector<128x8xf32>
    %cst_72 = arith.constant 0.000000e+00 : f32
    %117 = vector.broadcast %cst_72 : f32 to vector<128x8xf32>
    %118 = arith.maximumf %116, %117 : vector<128x8xf32>
    %119 = arith.truncf %118 : vector<128x8xf32> to vector<128x8xbf16>
    %c0_73 = arith.constant 0 : index
    %c0_74 = arith.constant 0 : index
    %120 = vector.load %arg9[%c0_73, %c0_74] : memref<8x32xbf16, #tpu.memory_space<vmem>>, vector<8x32xbf16>
    %cst_75 = arith.constant dense<0.000000e+00> : vector<128x32xf32>
    %121 = tpu.matmul %119, %120, %cst_75 {dimension_numbers = #tpu.dot_dimension_numbers<[1], [0], [0], [1], [0, 0, 1, 1], [], []>} : vector<128x8xbf16>, vector<8x32xbf16>, vector<128x32xf32> -> vector<128x32xf32>
    %c0_76 = arith.constant 0 : index
    %c0_77 = arith.constant 0 : index
    %122 = vector.load %arg10[%c0_76, %c0_77] : memref<1x32xf32, #tpu.memory_space<vmem>>, vector<1x32xf32>
    %123 = vector.broadcast %122 : vector<1x32xf32> to vector<128x32xf32>
    %124 = arith.addf %121, %123 : vector<128x32xf32>
    %125 = arith.addf %124, %6 : vector<128x32xf32>
    %cst_78 = arith.constant 0.000000e+00 : f32
    %126 = vector.broadcast %cst_78 : f32 to vector<128x32xf32>
    %127 = arith.maximumf %125, %126 : vector<128x32xf32>
    %128 = vector.shape_cast %127 : vector<128x32xf32> to vector<1x8x16x32xf32>
    %c0_79 = arith.constant 0 : index
    %c0_80 = arith.constant 0 : index
    %c0_81 = arith.constant 0 : index
    %c0_82 = arith.constant 0 : index
    %129 = vector.load %arg11[%c0_79, %c0_80, %c0_81, %c0_82] : memref<1x8x16x32xf32, #tpu.memory_space<vmem>>, vector<1x8x16x32xf32>
    tpu.vector_store %arg11[%c0_79, %c0_80, %c0_81, %c0_82], %128 {strides = array<i32>} : memref<1x8x16x32xf32, #tpu.memory_space<vmem>>, vector<1x8x16x32xf32>,
    return
  }
  func.func @transform_0(%arg0: i32, %arg1: i32) -> (i32, i32, i32, i32) {
    %c0_i32 = arith.constant 0 : i32
    %c0_i32_0 = arith.constant 0 : i32
    %c0_i32_1 = arith.constant 0 : i32
    return %arg0, %arg1, %c0_i32, %c0_i32_0 : i32, i32, i32, i32
  }
  func.func @transform_1(%arg0: i32, %arg1: i32) -> (i32, i32, i32, i32) {
    %c8_i32 = arith.constant 8 : i32
    %0 = arith.muli %arg1, %c8_i32 : i32
    %c1_i32 = arith.constant 1 : i32
    %1 = arith.subi %0, %c1_i32 : i32
    %c0_i32 = arith.constant 0 : i32
    %2 = arith.maxsi %1, %c0_i32 : i32
    %c0_i32_0 = arith.constant 0 : i32
    %c0_i32_1 = arith.constant 0 : i32
    %c0_i32_2 = arith.constant 0 : i32
    return %arg0, %2, %c0_i32_0, %c0_i32_1 : i32, i32, i32, i32
  }
  func.func @transform_2(%arg0: i32, %arg1: i32) -> (i32, i32, i32, i32) {
    %c1_i32 = arith.constant 1 : i32
    %0 = arith.addi %arg1, %c1_i32 : i32
    %c8_i32 = arith.constant 8 : i32
    %1 = arith.muli %0, %c8_i32 : i32
    %c15_i32 = arith.constant 15 : i32
    %2 = arith.minsi %1, %c15_i32 : i32
    %c0_i32 = arith.constant 0 : i32
    %c0_i32_0 = arith.constant 0 : i32
    %c0_i32_1 = arith.constant 0 : i32
    return %arg0, %2, %c0_i32, %c0_i32_0 : i32, i32, i32, i32
  }
  func.func @transform_3(%arg0: i32, %arg1: i32) -> (i32, i32) {
    %c0_i32 = arith.constant 0 : i32
    %c0_i32_0 = arith.constant 0 : i32
    %c0_i32_1 = arith.constant 0 : i32
    return %c0_i32, %c0_i32_0 : i32, i32
  }
  func.func @transform_4(%arg0: i32, %arg1: i32) -> (i32, i32) {
    %c0_i32 = arith.constant 0 : i32
    %c0_i32_0 = arith.constant 0 : i32
    %c0_i32_1 = arith.constant 0 : i32
    return %c0_i32, %c0_i32_0 : i32, i32
  }
  func.func @transform_5(%arg0: i32, %arg1: i32) -> (i32, i32, i32) {
    %c0_i32 = arith.constant 0 : i32
    %c0_i32_0 = arith.constant 0 : i32
    %c0_i32_1 = arith.constant 0 : i32
    %c0_i32_2 = arith.constant 0 : i32
    return %c0_i32, %c0_i32_0, %c0_i32_1 : i32, i32, i32
  }
  func.func @transform_6(%arg0: i32, %arg1: i32) -> (i32, i32) {
    %c0_i32 = arith.constant 0 : i32
    %c0_i32_0 = arith.constant 0 : i32
    %c0_i32_1 = arith.constant 0 : i32
    return %c0_i32, %c0_i32_0 : i32, i32
  }
  func.func @transform_7(%arg0: i32, %arg1: i32) -> (i32, i32) {
    %c0_i32 = arith.constant 0 : i32
    %c0_i32_0 = arith.constant 0 : i32
    %c0_i32_1 = arith.constant 0 : i32
    return %c0_i32, %c0_i32_0 : i32, i32
  }
  func.func @transform_8(%arg0: i32, %arg1: i32) -> (i32, i32) {
    %c0_i32 = arith.constant 0 : i32
    %c0_i32_0 = arith.constant 0 : i32
    %c0_i32_1 = arith.constant 0 : i32
    return %c0_i32, %c0_i32_0 : i32, i32
  }
  func.func @transform_9(%arg0: i32, %arg1: i32) -> (i32, i32, i32, i32) {
    %c0_i32 = arith.constant 0 : i32
    %c0_i32_0 = arith.constant 0 : i32
    %c0_i32_1 = arith.constant 0 : i32
    return %arg0, %arg1, %c0_i32, %c0_i32_0 : i32, i32, i32, i32
  }
}

</mosaic_0001>

<bundles_post_ra>
// kernel: tpu_custom_call.1
= control target key start
LH: loop header
LB: loop body
LE: loop exit
PB: predicated region body
PF: predicated region fallthrough
CT: control target
= control target key end

     0   :  { %s5305_s0 = inlined_call_operand.hbm [shape: f32[2,16,16,32], index: 0, kind: input, shape index: {}]   ;;  %s5306_s1 = inlined_call_operand.hbm [shape: f32[2,16,16,32], index: 1, kind: input, shape index: {}]   ;;  %s5307_s2 = inlined_call_operand.hbm [shape: f32[2,16,16,32], index: 2, kind: input, shape index: {}]   ;;  %s5308_s3 = inlined_call_operand.vmem [shape: bf16[32,8], index: 3, kind: input, shape index: {}]   ;;  %s5309_s4 = inlined_call_operand.vmem [shape: f32[1,8], index: 4, kind: input, shape index: {}]   ;;  %s5310_s5 = inlined_call_operand.vmem [shape: bf16[9,8,8], index: 5, kind: input, shape index: {}]   ;;  %s5311_s6 = inlined_call_operand.vmem [shape: f32[1,8], index: 6, kind: input, shape index: {}]   ;;  %s5312_s7 = inlined_call_operand.vmem [shape: bf16[8,32], index: 7, kind: input, shape index: {}]   ;;  %s5313_s8 = inlined_call_operand.vmem [shape: f32[1,32], index: 8, kind: input, shape index: {}]   ;;  %s5314_s9 = inlined_call_operand.hbm [shape: f32[2,16,16,32], index: 9, kind: output, shape index: {}]  }
   0x1   :  { %5340 = sst [smem:[#allocation26_spill]] %s5305_s0 }
   0x2   :  { %5341 = sst [smem:[#allocation27_spill]] %s5306_s1 }
   0x3   :  { %5342 = sst [smem:[#allocation28_spill]] %s5307_s2 }
   0x4   :  { %5343 = sst [smem:[#allocation29_spill]] %s5308_s3 }
   0x5   :  { %5344 = sst [smem:[#allocation30_spill]] %s5309_s4 }
   0x6   :  { %5345 = sst [smem:[#allocation31_spill]] %s5310_s5 }
   0x7   :  { %5346 = sst [smem:[#allocation32_spill]] %s5311_s6 }
   0x8   :  { %5347 = sst [smem:[#allocation33_spill]] %s5312_s7 }
   0x9   :  { %5348 = sst [smem:[#allocation34_spill]] %s5313_s8 }
   0xa   :  { %5349 = sst [smem:[#allocation35_spill]] %s5314_s9 }
   0xb   :  { %14 = vsyncpa [#allocation4], 0 }
   0xc   :  { %16 = vsyncpa [#allocation4 + $0x1], 0 }
   0xd   :  { %17 = vsyncpa [#allocation7], 0 }
   0xe   :  { %19 = vsyncpa [#allocation7 + $0x1], 0 }
   0xf   :  { %20 = vsyncpa [#allocation5], 0 }
  0x10   :  { %22 = vsyncpa [#allocation5 + $0x1], 0  ;;  %s4158_s30 = smov 0   ;;  %s4160_s10 = smov 0  }
  0x11   :  { %s4162_s11 = smov 0   ;;  %s4164_s12 = smov 0  }
  0x12   :  { %s4166_s13 = smov 0   ;;  %s4168_s14 = smov 0  }
  0x13   :  { %s4170_s15 = smov 0   ;;  %s4172_s16 = smov 0  }
  0x14   :  { %s4174_s17 = smov 0   ;;  %s4176_s18 = smov 0  }
  0x15   :  { %s4178_s19 = smov 0   ;;  %s4180_s20 = smov 0  }
  0x16   :  { %s4182_s21 = smov 0   ;;  %s4184_s22 = smov 0  }
  0x17 LB: > { %5350 = sst [smem:[#allocation14_spill]] %s4060_s13  ;;  %s4229_s23 = sadd.s32 4294967295, %s4096_s22   ;;  %s4096_s22 = sphi %s4184_s22, %s28_s22   ;;  %s4092_s21 = sphi %s4182_s21, %s5418_s21   ;;  %s4088_s20 = sphi %s4180_s20, %s5417_s20   ;;  %s4084_s19 = sphi %s4178_s19, %s5416_s19   ;;  %s4080_s18 = sphi %s4176_s18, %s5415_s18   ;;  %s4076_s17 = sphi %s4174_s17, %s5414_s17   ;;  %s4072_s16 = sphi %s4172_s16, %s5426_s16   ;;  %s4068_s15 = sphi %s4170_s15, %s5425_s15   ;;  %s4064_s14 = sphi %s4168_s14, %s5424_s14   ;;  %s4060_s13 = sphi %s4166_s13, %s5423_s13   ;;  %s4056_s12 = sphi %s4164_s12, %s5411_s12   ;;  %s4052_s11 = sphi %s4162_s11, %s5422_s11   ;;  %s4048_s10 = sphi %s4160_s10, %s5421_s10   ;;  %s4044_s30 = sphi %s4158_s30, %s5420_s30  }
  0x18   : > { %5351 = sst [smem:[#allocation15_spill]] %s4076_s17  ;;  %s37_s24 = sadd.s32 1, %s4088_s20 }
  0x19   : > { %5352 = sst [smem:[#allocation16_spill]] %s4080_s18  ;;  %p38_p0 = scmp.ge.s32.totalorder %s37_s24, 2 }
  0x1a   : > { %5353 = sst [smem:[#allocation17_spill]] %s4084_s19  ;;  %s40_s25 = sadd.s32 1, %s4092_s21 }
  0x1b   : > { %5354 = sst [smem:[#allocation18_spill]] %s4088_s20  ;;  %p5328_p1 = scmp.eq.s32.totalorder %s4096_s22, 0 }
  0x1c   : > { %5355 = sst [smem:[#allocation19_spill]] %s4092_s21  ;;  %p5327_p2 = scmp.eq.s32.totalorder %s4229_s23, 0 }
  0x1d   : > { %s5428_s24 = smov (%p38_p0, %s37_s24), 0  ;;  %s5430_s25 = smov (!%p38_p0, %s40_s25), %s4092_s21 }
  0x1e   : > { %5356 = sst [smem:[#allocation20_spill]] %s5428_s24  ;;  %s45_s26 = ssub.s32 %s4088_s20, %s5428_s24 }
  0x1f   : > { %s3082_s27 = sshll.u32 %s4088_s20, 3  ;;  %p42_p3 = scmp.ge.s32.totalorder %s5430_s25, 2 }
  0x20   : > { %s3083_s28 = sadd.s32 4294967295, %s3082_s27  ;;  %s3084_s29 = sshll.u32 %s5428_s24, 3 }
  0x21   : > { %p74_p4 = scmp.gt.s32.totalorder %s3083_s28, 0  ;;  %s5432_s25 = smov (%p42_p3, %s5430_s25), 0 }
  0x22   : > { %5357 = sst [smem:[#allocation21_spill]] %s5432_s25  ;;  %s4246_s9 = ssub.s32 %s4092_s21, %s5432_s25 }
  0x23   : > { %s5434_s28 = smov (!%p74_p4, %s3083_s28), 0  ;;  %5358 = sst [smem:[#allocation22_spill]] %s4246_s9 }
  0x24   : > { %s3085_s19 = sadd.s32 4294967295, %s3084_s29  ;;  %s4249_s8 = sor.u32 %s45_s26, %s4246_s9 }
  0x25   : > { %p78_p5 = scmp.gt.s32.totalorder %s3085_s19, 0  ;;  %s85_s6 = sadd.s32 1, %s4064_s14 }
  0x26   : > { %p92_p7 = scmp.ne.s32.totalorder %s4064_s14, %s4060_s13  ;;  %p98_p8 = scmp.ne.s32.totalorder %s4060_s13, %s4056_s12 }
  0x27   : > { %s5436_s19 = smov (!%p78_p5, %s3085_s19), 0  ;;  %s4257_s25 = sadd.s32 8, %s3082_s27 }
  0x28   : > { %s81_s24 = ssub.s32 %s5434_s28, %s5436_s19  ;;  %p4262_p9 = por %p92_p7, %p5328_p1 }
  0x29   : > { %s82_s7 = sor.u32 %s81_s24, %s4246_s9  ;;  %p4268_p11 = por %p98_p8, %p5327_p2 }
  0x2a   : > { %p83_p10 = scmp.eq.s32.totalorder %s82_s7, 0  ;;  %s4273_s12 = sadd.s32 8, %s3084_s29 }
  0x2b   : > { %s5360_s4 = scalar_select %p4268_p11, 1, 0 }
  0x2c   : > { %s4276_s19 = scalar_select %p83_p10, %s4064_s14, %s85_s6  }
  0x2d   : > { %5361 = sst [smem:[#allocation23_spill]] %s5360_s4  ;;  %p5326_p0 = scmp.lt.s32.totalorder %s4096_s22, 4 }
  0x2e   : > { %5362 = sst [smem:[#allocation24_spill]] %s4276_s19  ;;  %s4281_s24 = sshll.u32 %s4092_s21, 5 }
  0x2f   : > { %s354_s7 = sand.u32 1, %s4096_s22   ;;  %s356_s27 = sand.u32 1, %s4064_s14  }
  0x30   : > { %s3095_s5 = sshll.u32 %s356_s27, 4  ;;  %s3098_s18 = sshll.u32 %s5434_s28, 1 }
  0x31   : > { %s368_s3 = sadd.s32 %s3098_s18, %s4281_s24  ;;  %s358_s4 = scalar_lea.vmem [#allocation6], %s3095_s5 }
  0x32   : > { %s371_s13 = sshll.u32 %s358_s4, 4  ;;  %s3100_s2 = sshll.u32 %s368_s3, 7  ;;  %s4286_s13 = int_to_ptr.vmem [resolvable:$true] %s371_s13 }
  0x33   : > { %s5363_s1 = sld [smem:[#allocation27_spill]]  ;;  %p4297_p3 = pnand %p5326_p0, %p4262_p9 }
  0x34   : > { %s4303_s3 = scalar_lea.sflag [#allocation7], %s354_s7 }
  0x35   : > { %p3854_p8 = pneg %p4297_p3 }
  0x39   : > { %s4291_s6 = scalar_lea.hbm %s5363_s1, %s3100_s2  ;;  %s3857_s9 = scalar_lea.hbm %s5363_s1, 8192 }
  0x3a   : > { %s3852_s4 = scalar_lea.hbm %s4291_s6, 256  ;;  %p3858_p9 = scmp.lt.u32.totalorder %s4291_s6, %s5363_s1 }
  0x3b   : > { %p3853_p7 = scmp.ne.s32.totalorder %s4291_s6, %s3852_s4  ;;  %p3859_p12 = scmp.lt.u32.totalorder %s3857_s9, %s3852_s4 }
  0x3c   : > { %p3861_p2 = scmp.lt.u32.totalorder %s3852_s4, %s4291_s6 }
  0x3d   : > { %p3855_p10 = pnand %p3854_p8, %p3853_p7  ;;  %p3860_p0 = por %p3859_p12, %p3858_p9 }
  0x3f   : > { %p3856_p13 = pneg %p3855_p10  ;;  %p3862_p1 = por %p3861_p2, %p3860_p0 }
  0x41   : > { %p3863_p6 = pnand %p3862_p1, %p3856_p13 }
  0x43   : > { %3866 = shalt.err (!%p3863_p6)
}
  0x44   : > { %s3867_s26 = scalar_lea.vmem %s4286_s13, 256  ;;  %s4098_s7 = smov [#allocation6]  }
  0x45   : > { %p3868_p7 = scmp.ne.s32.totalorder %s4286_s13, %s3867_s26  ;;  %s3872_s29 = sshll.u32 %s4098_s7, 4  ;;  %s3873_s29 = int_to_ptr.vmem [resolvable:$false] %s3872_s29 }
  0x46   : > { %s3874_s2 = scalar_lea.vmem %s3873_s29, 512  ;;  %p3875_p5 = scmp.lt.s32.totalorder %s4286_s13, %s3873_s29 }
  0x47   : > { %p3870_p10 = pnand %p3868_p7, %p3854_p8  ;;  %p3876_p12 = scmp.lt.s32.totalorder %s3874_s2, %s3867_s26 }
  0x49   : > { %p3871_p4 = pneg %p3870_p10  ;;  %p3877_p9 = por %p3876_p12, %p3875_p5 }
  0x4b   : > { %p3878_p2 = pnand %p3877_p9, %p3871_p4 }
  0x4d   : > { %3881 = shalt.err (!%p3878_p2)
}
  0x4e   : > { %s5329_s4 = smov 128   ;;  %s5331_s5 = smov 8  }
  0x4f   : > { %3706 = dma.hbm_to_vmem [thread:$0]  (!%p4297_p3), %s4291_s6, 256, %s4286_s13, %s4303_s3, %s5329_s4, %s5329_s4, %s5331_s5  }
  0x50   : > { %p5365_p1 = scmp.lt.s32.totalorder %s4096_s22, 5  ;;  %p5366_p6 = scmp.ge.s32.totalorder %s4096_s22, 1 }
  0x51   : > { %s3081_s18 = sadd.s32 4294967294, %s4096_s22   ;;  %s49_s28 = sadd.s32 1, %s4076_s17 }
  0x52   : > { %p4338_p13 = pnand %p5366_p6, %p5365_p1  ;;  %p5368_p0 = scmp.eq.s32.totalorder %s4249_s8, 0 }
  0x53   : > { %p56_p4 = scmp.ne.s32.totalorder %s4076_s17, %s4072_s16  ;;  %p62_p5 = scmp.ne.s32.totalorder %s4072_s16, %s4068_s15 }
  0x54   : > { %s4347_s26 = scalar_select %p5368_p0, %s4076_s17, %s49_s28  }
  0x55   : > { %p286_p8 = scmp.eq.s32.totalorder %s4229_s23, 3  ;;  %p292_p7 = scmp.eq.s32.totalorder %s3081_s18, 3 }
  0x56   : > { %5369 = sst [smem:[#allocation25_spill]] %s4347_s26  ;;  %p5370_p10 = scmp.eq.s32.totalorder %s4096_s22, 0 }
  0x57   : > { %p5372_p3 = scmp.eq.s32.totalorder %s4229_s23, 0  ;;  %p4366_p2 = por %p286_p8, %p56_p4 }
  0x58   : > { %p4356_p12 = por %p5370_p10, %p56_p4  ;;  %p4370_p1 = por %p292_p7, %p62_p5 }
  0x59   : > { %p4362_p9 = por %p5372_p3, %p62_p5  ;;  %s330_s7 = sand.u32 1, %s4076_s17  }
  0x5a   : > { %s5374_s8 = scalar_select %p4366_p2, 1, 0 }
  0x5b   : > { %s5373_s6 = scalar_select %p4362_p9, 1, 0 }
  0x5c   : > { %s5375_s27 = scalar_select %p4370_p1, 1, 0 }
  0x5d   : > { %s3225_s29 = sshll.u32 %s4088_s20, 4  ;;  %s3090_s2 = sshll.u32 %s330_s7, 7 }
  0x5e   : > { %s341_s18 = sadd.s32 %s3225_s29, %s4281_s24  ;;  %s334_s4 = scalar_lea.vmem [#allocation3], %s3090_s2 }
  0x5f   : > { %s3094_s28 = sshll.u32 %s341_s18, 7  ;;  %s344_s5 = sshll.u32 %s334_s4, 4  ;;  %s4382_s5 = int_to_ptr.vmem [resolvable:$true] %s344_s5 }
  0x60   : > { %s5376_s0 = sld [smem:[#allocation26_spill]]  ;;  %p5377_p6 = scmp.lt.s32.totalorder %s4096_s22, 4 }
  0x61   : > { %s4392_s4 = scalar_lea.sflag [#allocation4], %s330_s7 }
  0x62   : > { %p4388_p0 = pnand %p5377_p6, %p4356_p12 }
  0x64   : > { %p3884_p5 = pneg %p4388_p0 }
  0x66   : > { %s4380_s26 = scalar_lea.hbm %s5376_s0, %s3094_s28  ;;  %s3887_s13 = scalar_lea.hbm %s5376_s0, 8192 }
  0x67   : > { %s3882_s29 = scalar_lea.hbm %s4380_s26, 2048  ;;  %p3888_p10 = scmp.lt.u32.totalorder %s4380_s26, %s5376_s0 }
  0x68   : > { %p3883_p4 = scmp.ne.s32.totalorder %s4380_s26, %s3882_s29  ;;  %p3889_p12 = scmp.lt.u32.totalorder %s3887_s13, %s3882_s29 }
  0x69   : > { %p3891_p6 = scmp.lt.u32.totalorder %s3882_s29, %s4380_s26 }
  0x6a   : > { %p3885_p8 = pnand %p3884_p5, %p3883_p4  ;;  %p3890_p3 = por %p3889_p12, %p3888_p10 }
  0x6c   : > { %p3886_p7 = pneg %p3885_p8  ;;  %p3892_p1 = por %p3891_p6, %p3890_p3 }
  0x6e   : > { %p3893_p2 = pnand %p3892_p1, %p3886_p7 }
  0x70   : > { %3896 = shalt.err (!%p3893_p2)
}
  0x71   : > { %s3897_s7 = scalar_lea.vmem %s4382_s5, 2048  ;;  %s4101_s28 = smov [#allocation3]  }
  0x72   : > { %p3898_p4 = scmp.ne.s32.totalorder %s4382_s5, %s3897_s7  ;;  %s3902_s1 = sshll.u32 %s4101_s28, 4  ;;  %s3903_s1 = int_to_ptr.vmem [resolvable:$false] %s3902_s1 }
  0x73   : > { %s3904_s21 = scalar_lea.vmem %s3903_s1, 4096  ;;  %p3905_p9 = scmp.lt.s32.totalorder %s4382_s5, %s3903_s1 }
  0x74   : > { %p3900_p8 = pnand %p3898_p4, %p3884_p5  ;;  %p3906_p10 = scmp.lt.s32.totalorder %s3904_s21, %s3897_s7 }
  0x76   : > { %p3901_p11 = pneg %p3900_p8  ;;  %p3907_p12 = por %p3906_p10, %p3905_p9 }
  0x78   : > { %p3908_p3 = pnand %p3907_p12, %p3901_p11 }
  0x7a   : > { %3911 = shalt.err (!%p3908_p3)
}
  0x7b   : > { %s5379_s29 = smov 8   ;;  %s5380_s13 = smov 128  }
  0x7c   : > { %s5381_s2 = sld [smem:[#allocation22_spill]]  ;;  %p5382_p11 = scmp.lt.s32.totalorder %s4257_s25, 15 }
  0x7d   : > { %3703 = dma.hbm_to_vmem [thread:$0]  (!%p4388_p0), %s4380_s26, 2048, %s4382_s5, %s4392_s4, %s5380_s13, %s5380_s13, %s5379_s29  }
  0x7e   : > { %s5438_s25 = smov (!%p5382_p11, %s4257_s25), 15  ;;  %p5383_p9 = scmp.lt.s32.totalorder %s4273_s12, 15 }
  0x7f   : > { %s121_s20 = sadd.s32 1, %s4052_s11  ;;  %p128_p2 = scmp.ne.s32.totalorder %s4052_s11, %s4048_s10 }
  0x80   : > { %s5440_s12 = smov (!%p5383_p9, %s4273_s12), 15  ;;  %p134_p1 = scmp.ne.s32.totalorder %s4048_s10, %s4044_s30 }
  0x81   : > { %s117_s18 = ssub.s32 %s5438_s25, %s5440_s12  ;;  %p5384_p5 = scmp.eq.s32.totalorder %s4096_s22, 0 }
  0x82   : > { %s118_s7 = sor.u32 %s117_s18, %s5381_s2  ;;  %p5386_p4 = scmp.eq.s32.totalorder %s4229_s23, 0 }
  0x83   : > { %p4437_p7 = por %p128_p2, %p5384_p5  ;;  %p119_p6 = scmp.eq.s32.totalorder %s118_s7, 0 }
  0x84   : > { %p4443_p8 = por %p134_p1, %p5386_p4  ;;  %s383_s26 = sand.u32 1, %s4052_s11  }
  0x85   : > { %s3103_s4 = sshll.u32 %s5438_s25, 1  ;;  %s3101_s12 = sshll.u32 %s383_s26, 4 }
  0x86   : > { %s5387_s5 = scalar_select %p4443_p8, 1, 0 }
  0x87   : > { %s4449_s1 = scalar_select %p119_p6, %s4052_s11, %s121_s20  }
  0x88   : > { %s395_s21 = sadd.s32 %s3103_s4, %s4281_s24  ;;  %s5388_s0 = sld [smem:[#allocation28_spill]] }
  0x89   : > { %s3105_s30 = sshll.u32 %s395_s21, 7  ;;  %s385_s7 = scalar_lea.vmem [#allocation8], %s3101_s12 }
  0x8a   : > { %s398_s19 = sshll.u32 %s385_s7, 4  ;;  %p5389_p0 = scmp.lt.s32.totalorder %s4096_s22, 4  ;;  %s4457_s19 = int_to_ptr.vmem [resolvable:$true] %s398_s19 }
  0x8c   : > { %p4463_p10 = pnand %p5389_p0, %p4437_p7 }
  0x8e   : > { %s4455_s17 = scalar_lea.hbm %s5388_s0, %s3105_s30  ;;  %p3914_p3 = pneg %p4463_p10 }
  0x8f   : > { %s3912_s24 = scalar_lea.hbm %s4455_s17, 256  ;;  %s3917_s4 = scalar_lea.hbm %s5388_s0, 8192 }
  0x90   : > { %p3913_p12 = scmp.ne.s32.totalorder %s4455_s17, %s3912_s24  ;;  %p3918_p2 = scmp.lt.u32.totalorder %s4455_s17, %s5388_s0 }
  0x91   : > { %p3919_p1 = scmp.lt.u32.totalorder %s3917_s4, %s3912_s24  ;;  %p3921_p7 = scmp.lt.u32.totalorder %s3912_s24, %s4455_s17 }
  0x92   : > { %p3915_p11 = pnand %p3914_p3, %p3913_p12 }
  0x93   : > { %p3920_p5 = por %p3919_p1, %p3918_p2 }
  0x94   : > { %p3916_p9 = pneg %p3915_p11 }
  0x95   : > { %p3922_p6 = por %p3921_p7, %p3920_p5 }
  0x97   : > { %p3923_p4 = pnand %p3922_p6, %p3916_p9 }
  0x99   : > { %3926 = shalt.err (!%p3923_p4)
}
  0x9a   : > { %s3927_s21 = scalar_lea.vmem %s4457_s19, 256  ;;  %s4102_s30 = smov [#allocation8]  }
  0x9b   : > { %p3928_p0 = scmp.ne.s32.totalorder %s4457_s19, %s3927_s21  ;;  %s3932_s2 = sshll.u32 %s4102_s30, 4  ;;  %s3933_s2 = int_to_ptr.vmem [resolvable:$false] %s3932_s2 }
  0x9c   : > { %s3934_s18 = scalar_lea.vmem %s3933_s2, 512  ;;  %p3935_p8 = scmp.lt.s32.totalorder %s4457_s19, %s3933_s2 }
  0x9d   : > { %p3930_p12 = pnand %p3928_p0, %p3914_p3  ;;  %p3936_p2 = scmp.lt.s32.totalorder %s3934_s18, %s3927_s21 }
  0x9f   : > { %p3931_p11 = pneg %p3930_p12  ;;  %p3937_p1 = por %p3936_p2, %p3935_p8 }
  0xa1   : > { %p3938_p5 = pnand %p3937_p1, %p3931_p11 }
  0xa3   : > { %3941 = shalt.err (!%p3938_p5)
}
  0xa4   : > { %3709 = dma.hbm_to_vmem [thread:$0]  (!%p4463_p10), %s4455_s17, 256, %s4457_s19, %s4303_s3, %s5380_s13, %s5380_s13, %s5379_s29  }
  0xa5   : > { %410 = sbr.rel (%p4338_p13) target bundleno = 1079 (0x437), region = 56  ;;  %s4499_s7 = sand.u32 (!%p4338_p13), 1, %s4072_s16  }
  0xa6   : > { %s3107_s24 = sshll.u32 (!%p4338_p13), %s4499_s7, 7  ;;  %s413_s20 = scalar_lea.sflag (!%p4338_p13), [#allocation4], %s4499_s7 }
  0xa7   : > { %s4505_s25 = scalar_lea.vmem (!%p4338_p13), [#allocation3], %s3107_s24  ;;  %p5391_p8 = scmp.ne.s32.totalorder (!%p4338_p13), %s5373_s6, 0 }
  0xac   : > { %4027 = dma.done.wait (%p5391_p8), %s413_s20, 2048  }
  0xad   : > { %4029 = vsyncadd (%p5391_p8), %s413_s20, 4294965248  ;;  %s5392_s17 = sld [smem:[#allocation14_spill]]  ;;  %s5393_s19 = sld [smem:[#allocation23_spill]] }
  0xae   : > { %s421_s3 = sand.u32 1, %s4229_s23  }
  0xaf   : > { %s422_s13 = scalar_lea.sflag [#allocation7], %s421_s3 }
  0xb3   : > { %s423_s9 = sand.u32 1, %s5392_s17   ;;  %p5394_p13 = scmp.ne.s32.totalorder %s5393_s19, 0 }
  0xb4   : > { %s4513_s29 = sshll.u32 %s423_s9, 4 }
  0xb5   : > { %s425_s26 = scalar_lea.vmem [#allocation6], %s4513_s29 }
  0xb6   : > { %4031 = dma.done.wait (%p5394_p13), %s422_s13, 256  }
  0xb7   : > { %4033 = vsyncadd (%p5394_p13), %s422_s13, 4294967040  ;;  %s432_s4 = sand.u32 1, %s4048_s10   ;;  %p5395_p10 = scmp.ne.s32.totalorder %s5387_s5, 0 }
  0xb8   : > { %s4521_s6 = sshll.u32 %s432_s4, 4 }
  0xb9   : > { %s434_s28 = scalar_lea.vmem [#allocation8], %s4521_s6 }
  0xba   : > { %4035 = dma.done.wait (%p5395_p10), %s422_s13, 256  }
  0xbb   : > { %4037 = vsyncadd (%p5395_p10), %s422_s13, 4294967040  ;;  %vm495_vm0 = vcmask 64512   ;;  %v4103_v0 = vmov 0.0   ;;  %vm4104_vm1 = vmmov 0   ;;  %s5396_s12 = sld [smem:[#allocation29_spill]]  ;;  %v536_v3 = vld [vmem:[%s4505_s25] sm:$0xff] }
  0xbc   : > { %3355 = vmatprep.subr.bf16.mxu1 %v4103_v0  ;;  %3359 = vmatprep.mubr.msk.bf16.mxu1 %vm4104_vm1, %v4103_v0  ;;  %497 = vst.msk [vmem:[#allocation2 + $0x8] sm:$0xff] %vm495_vm0, %v4103_v0  ;;  %496 = vst.msk [vmem:[#allocation2] sm:$0xff] %vm495_vm0, %v4103_v0  ;;  %v537_v4 = vld [vmem:[%s4505_s25 + $0x8] sm:$0xff]  ;;  %vm578_vm2 = vcmask 261120   ;;  %v739_v5 = vld [vmem:[%s425_s26] sm:$0xff]  ;;  %s5398_s18 = sld [smem:[#allocation16_spill]] }
  0xbd   : > { %498 = vst.msk [vmem:[#allocation2 + $0x10] sm:$0xff] %vm495_vm0, %v4103_v0  ;;  %499 = vst.msk [vmem:[#allocation2 + $0x18] sm:$0xff] %vm495_vm0, %v4103_v0  ;;  %v552_v6 = vpack.c.bf16 %v537_v4, %v536_v3  ;;  %v740_v7 = vld [vmem:[%s425_s26 + $0x8] sm:$0xff]  ;;  %v538_v8 = vld [vmem:[%s4505_s25 + $0x10] sm:$0xff]  ;;  %s5399_s19 = sld [smem:[#allocation31_spill]]  ;;  %vm1004_vm3 = vcmask 1043456  }
  0xbe   : > { %500 = vst.msk [vmem:[#allocation2 + $0x20] sm:$0xff] %vm495_vm0, %v4103_v0  ;;  %501 = vst.msk [vmem:[#allocation2 + $0x28] sm:$0xff] %vm495_vm0, %v4103_v0  ;;  %v539_v9 = vld [vmem:[%s4505_s25 + $0x18] sm:$0xff]  ;;  %v540_v10 = vld [vmem:[%s4505_s25 + $0x20] sm:$0xff]  ;;  %v741_v12 = vpack.c.bf16 %v740_v7, %v739_v5  ;;  %vm904_vm4 = vcmask 1040384   ;;  %vm1237_vm5 = vcmask 1046528  }
  0xbf   : > { %502 = vst.msk [vmem:[#allocation2 + $0x30] sm:$0xff] %vm495_vm0, %v4103_v0  ;;  %503 = vst.msk [vmem:[#allocation2 + $0x38] sm:$0xff] %vm495_vm0, %v4103_v0  ;;  %v541_v11 = vld [vmem:[%s4505_s25 + $0x28] sm:$0xff]  ;;  %3339 = vmatprep.mubr.msk.bf16.mxu0 %vm578_vm2, %v552_v6  ;;  %v553_v13 = vpack.c.bf16 %v539_v9, %v538_v8  ;;  %v793_v15 = vld [vmem:[%s434_s28] sm:$0xff]  ;;  %s5403_s17 = sld [smem:[#allocation32_spill]]  ;;  %s5404_s29 = sld [smem:[#allocation34_spill]] }
  0xc0   : > { %504 = vst.msk [vmem:[#allocation2 + $0x40] sm:$0xff] %vm495_vm0, %v4103_v0  ;;  %505 = vst.msk [vmem:[#allocation2 + $0x48] sm:$0xff] %vm495_vm0, %v4103_v0  ;;  %v554_v14 = vpack.c.bf16 %v541_v11, %v540_v10  ;;  %v794_v16 = vld [vmem:[%s434_s28 + $0x8] sm:$0xff]  ;;  %v542_v17 = vld [vmem:[%s4505_s25 + $0x30] sm:$0xff]  ;;  %s5161_s13 = scalar_lea.vmem [#allocation9], %s3107_s24  ;;  %s5405_s24 = sld [smem:[#allocation17_spill]] }
  0xc1   : > { %506 = vst.msk [vmem:[#allocation2 + $0x50] sm:$0xff] %vm495_vm0, %v4103_v0  ;;  %507 = vst.msk [vmem:[#allocation2 + $0x58] sm:$0xff] %vm495_vm0, %v4103_v0  ;;  %s5397_s2 = smov %s5396_s12  ;;  %v3834_v1 = vld [vmem:[%s5396_s12] sm:$0xff]   ;;  %v543_v18 = vld [vmem:[%s4505_s25 + $0x38] sm:$0xff]  ;;  %v795_v21 = vpack.c.bf16 %v794_v16, %v793_v15  ;;  %s5401_s12 = sld [smem:[#allocation30_spill]] }
  0xc2   : > { %508 = vst.msk [vmem:[#allocation2 + $0x60] sm:$0xff] %vm495_vm0, %v4103_v0  ;;  %509 = vst.msk [vmem:[#allocation2 + $0x68] sm:$0xff] %vm495_vm0, %v4103_v0  ;;  %v3835_v2 = vld [vmem:[%s5397_s2 + $0x8] sm:$0xff]   ;;  %3335 = vmatprep.subr.bf16.mxu0 %v3834_v1  ;;  %3356 = vmatpush3.bf16.msra.mxu1 %v3834_v1  ;;  %v544_v19 = vld [vmem:[%s4505_s25 + $0x40] sm:$0xff]  ;;  %v555_v22 = vpack.c.bf16 %v543_v18, %v542_v17  ;;  %p733_p3 = scmp.gt.s32.totalorder %s5398_s18, 0  ;;  %p736_p9 = scmp.lt.s32.totalorder %s5398_s18, 1 }
  0xc3   : > { %510 = vst.msk [vmem:[#allocation2 + $0x70] sm:$0xff] %vm495_vm0, %v4103_v0  ;;  %511 = vst.msk [vmem:[#allocation2 + $0x78] sm:$0xff] %vm495_vm0, %v4103_v0  ;;  %3336 = vmatpush3.bf16.msra.mxu0 %v3834_v1  ;;  %3357 = vmatprep.subr.bf16.mxu1 %v4103_v0  ;;  %v545_v20 = vld [vmem:[%s4505_s25 + $0x48] sm:$0xff]  ;;  %v546_v24 = vld [vmem:[%s4505_s25 + $0x50] sm:$0xff]  ;;  %s5400_s3 = smov %s5399_s19  ;;  %s3228_s26 = sshll.u32 %s5398_s18, 4 }
  0xc4   : > { %512 = vst.msk [vmem:[#allocation2 + $0x80] sm:$0xff] %vm495_vm0, %v4103_v0  ;;  %513 = vst.msk [vmem:[#allocation2 + $0x88] sm:$0xff] %vm495_vm0, %v4103_v0  ;;  %3337 = vmatprep.subr.bf16.mxu0 %v3835_v2  ;;  %v556_v23 = vpack.c.bf16 %v545_v20, %v544_v19  ;;  %v547_v25 = vld [vmem:[%s4505_s25 + $0x58] sm:$0xff]  ;;  %v548_v26 = vld [vmem:[%s4505_s25 + $0x60] sm:$0xff]  ;;  %s734_s28 = scalar_select %p733_p3, 1, 0 }
  0xc5   : > { %514 = vst.msk [vmem:[#allocation2 + $0x90] sm:$0xff] %vm495_vm0, %v4103_v0  ;;  %515 = vst.msk [vmem:[#allocation2 + $0x98] sm:$0xff] %vm495_vm0, %v4103_v0  ;;  %v549_v27 = vld [vmem:[%s4505_s25 + $0x68] sm:$0xff]  ;;  %v557_v28 = vpack.c.bf16 %v547_v25, %v546_v24  ;;  %v550_v30 = vld [vmem:[%s4505_s25 + $0x70] sm:$0xff]  ;;  %s4696_s30 = scalar_select %p736_p9, 1, 0 }
  0xc6   : > { %516 = vst.msk [vmem:[#allocation2 + $0xa0] sm:$0xff] %vm495_vm0, %v4103_v0  ;;  %517 = vst.msk [vmem:[#allocation2 + $0xa8] sm:$0xff] %vm495_vm0, %v4103_v0  ;;  %3358 = vmatpush3.bf16.msra.mxu1 %v3835_v2  ;;  %v558_v29 = vpack.c.bf16 %v549_v27, %v548_v26  ;;  %v551_v31 = vld [vmem:[%s4505_s25 + $0x78] sm:$0xff]  ;;  %v3124_v33 = vld [vmem:[%s5399_s19 + $0x4] sm:$0xf]  ;;  %s735_s21 = scvt.s32.f32 %s734_s28  ;;  %s3217_s4 = sshll.u32 %s5405_s24, 5 }
  0xc7   : > { %518 = vst.msk [vmem:[#allocation2 + $0xb0] sm:$0xff] %vm495_vm0, %v4103_v0  ;;  %519 = vst.msk [vmem:[#allocation2 + $0xb8] sm:$0xff] %vm495_vm0, %v4103_v0  ;;  %3338 = vmatpush3.bf16.msra.mxu0 %v3835_v2  ;;  %3363 = vmatprep.subr.bf16.mxu1 %v4103_v0  ;;  %v559_v32 = vpack.c.bf16 %v551_v31, %v550_v30  ;;  %v1006_v34 = vsel %vm1004_vm3, %v3124_v33, 0  ;;  %v4664_v35 = vld [vmem:[%s5400_s3 + $0xc] sm:$0xf]  ;;  %s738_s20 = scvt.s32.f32 %s4696_s30  ;;  %s2938_s18 = sadd.s32 %s3228_s26, %s3217_s4 }
  0xc8   : > { %520 = vst.msk [vmem:[#allocation2 + $0xc0] sm:$0xff] %vm495_vm0, %v4103_v0  ;;  %521 = vst.msk [vmem:[#allocation2 + $0xc8] sm:$0xff] %vm495_vm0, %v4103_v0  ;;  %3681 = vmatprep.subr.msk.bf16.mxu0 %vm1004_vm3, %v3124_v33  ;;  %v4670_v36 = vsel %vm1004_vm3, %v4664_v35, 0  ;;  %v4676_v37 = vld [vmem:[%s5400_s3 + $0x10] sm:$0xf]  ;;  %v788_v44 = vstv %s735_s21  ;;  %s5402_s21 = sld [smem:[#allocation33_spill]] }
  0xc9   : > { %522 = vst.msk [vmem:[#allocation2 + $0xd0] sm:$0xff] %vm495_vm0, %v4103_v0  ;;  %523 = vst.msk [vmem:[#allocation2 + $0xd8] sm:$0xff] %vm495_vm0, %v4103_v0  ;;  %3360 = vmatmul.mubr.msk.bf16.vlgmr.msra.gmra.mrb[0].mxu1 %vm578_vm2, %v741_v12  ;;  %v4683_v38 = vld [vmem:[%s5400_s3] sm:$0xf]  ;;  %v4711_v5 = vstv %s738_s20  ;;  %s2941_s6 = sshll.u32 %s5161_s13, 4  ;;  %s3218_s28 = sshll.u32 %s2938_s18, 7  ;;  %s5216_s6 = int_to_ptr.vmem [resolvable:$true] %s2941_s6 }
  0xca   : > { %524 = vst.msk [vmem:[#allocation2 + $0xe0] sm:$0xff] %vm495_vm0, %v4103_v0  ;;  %525 = vst.msk [vmem:[#allocation2 + $0xe8] sm:$0xff] %vm495_vm0, %v4103_v0  ;;  %3340 = vmatmul.mubr.msk.bf16.vlgmr.msra.gmra.mrb[0].mxu0 %vm578_vm2, %v553_v13  ;;  %3364 = vmatpush3.bf16.msra.mxu1 %v3834_v1  ;;  %v4691_v39 = vld [vmem:[%s5401_s12] ss:$0 sm:$0xff]  ;;  %v1130_v30 = vsel %vm1004_vm3, %v4683_v38, 0  ;;  %s5406_s12 = sld [smem:[#allocation35_spill]] }
  0xcb   : > { %526 = vst.msk [vmem:[#allocation2 + $0xf0] sm:$0xff] %vm495_vm0, %v4103_v0  ;;  %527 = vst.msk [vmem:[#allocation2 + $0xf8] sm:$0xff] %vm495_vm0, %v4103_v0  ;;  %3343 = vmatprep.mubr.msk.bf16.mxu0 %vm578_vm2, %v554_v14  ;;  %3365 = vmatprep.subr.bf16.mxu1 %v4103_v0  ;;  %s3942_s30 = scalar_lea.vmem %s5216_s6, 2048  ;;  %p5408_p6 = scmp.ne.s32.totalorder %s5374_s8, 0 }
  0xcc   : > { %528 = vst.msk [vmem:[#allocation2 + $0x100] sm:$0xff] %vm495_vm0, %v4103_v0  ;;  %529 = vst.msk [vmem:[#allocation2 + $0x108] sm:$0xff] %vm495_vm0, %v4103_v0  ;;  %3367 = vmatprep.mubr.msk.bf16.mxu1 %vm4104_vm1, %v4103_v0  ;;  %3372 = vmatpush3.bf16.msra.mxu0 %v1006_v34  ;;  %v4754_v34 = vld [vmem:[%s5400_s3 + $0x8] sm:$0xf]  ;;  %p3943_p7 = scmp.ne.s32.totalorder %s5216_s6, %s3942_s30  ;;  %s4105_s20 = smov [#allocation9]  }
  0xcd   : > { %530 = vst.msk [vmem:[#allocation2 + $0x110] sm:$0xff] %vm495_vm0, %v4103_v0  ;;  %531 = vst.msk [vmem:[#allocation2 + $0x118] sm:$0xff] %vm495_vm0, %v4103_v0  ;;  %3682 = vmatprep.subr.msk.bf16.mxu0 %vm1004_vm3, %v4683_v38 }
  0xce   : > { %532 = vst.msk [vmem:[#allocation2 + $0x120] sm:$0xff] %vm495_vm0, %v4103_v0  ;;  %533 = vst.msk [vmem:[#allocation2 + $0x128] sm:$0xff] %vm495_vm0, %v4103_v0  ;;  %3366 = vmatpush3.bf16.msra.mxu1 %v3835_v2  ;;  %p3944_p4 = pnand %p3943_p7, %p5408_p6 }
  0xcf   : > { %534 = vst.msk [vmem:[#allocation2 + $0x130] sm:$0xff] %vm495_vm0, %v4103_v0  ;;  %535 = vst.msk [vmem:[#allocation2 + $0x138] sm:$0xff] %vm495_vm0, %v4103_v0  ;;  %3685 = vmatprep.subr.msk.bf16.mxu1 %vm1004_vm3, %v4664_v35 }
  0xd0   : > { %s5407_s9 = smov %s5406_s12  ;;  %p3945_p0 = pneg %p3944_p4 }
  0xd1   : > { %3368 = vmatmul.mubr.msk.bf16.vlgmr.msra.gmra.mrb[4].mxu1 %vm578_vm2, %v795_v21 }
  0xd2   : > { %3344 = vmatmul.mubr.msk.bf16.gmra.mrb[4].mxu0 %vm578_vm2, %v555_v22  ;;  %3552 = vmatpush3.bf16.msra.mxu1 %v4670_v36 }
  0xd3   : > { %3347 = vmatprep.mubr.msk.bf16.mxu0 %vm578_vm2, %v556_v23  ;;  %3686 = vmatprep.subr.msk.bf16.mxu1 %vm1004_vm3, %v4676_v37 }
  0xda   : > { %3348 = vmatmul.mubr.msk.bf16.gmra.mrb[8].mxu0 %vm578_vm2, %v557_v28 }
  0xdb   : > { %3351 = vmatprep.mubr.msk.bf16.mxu0 %vm578_vm2, %v558_v29 }
  0xe2   : > { %3352 = vmatmul.mubr.msk.bf16.gmra.mrb[12].mxu0 %vm578_vm2, %v559_v32 }
 0x19c   : > { %v779_v40 = vpop.f32.mrb[0].mxu1 }
 0x19d   : > { %v780_v41 = vadd.f32 %v4691_v39, %v779_v40  ;;  %v3341_v42 = vpop.f32.mrb[0].mxu0  ;;  %v3361_v43 = vpop.f32.mrb[1].mxu1 }
 0x19e   : > { %v646_v45 = vadd.f32 %v3341_v42, %v4691_v39  ;;  %v637_v46 = vpop.f32.mrb[1].mxu0  ;;  %v782_v47 = vpop.f32.mrb[2].mxu1 }
 0x19f   : > { %v786_v48 = vmax.f32 %v780_v41, 0.0  ;;  %v638_v49 = vadd.f32 %v4691_v39, %v637_v46  ;;  %v783_v50 = vadd.f32 %v4691_v39, %v782_v47  ;;  %v3342_v51 = vpop.f32.mrb[2].mxu0  ;;  %v3362_v52 = vpop.f32.mrb[3].mxu1 }
 0x1a0   : > { %v702_v53 = vmax.f32 %v646_v45, 0.0  ;;  %v649_v54 = vadd.f32 %v3342_v51, %v4691_v39  ;;  %v640_v55 = vpop.f32.mrb[3].mxu0 }
 0x1a1   : > { %v789_v56 = vmul.f32 %v788_v44, %v786_v48  ;;  %v700_v57 = vmax.f32 %v638_v49, 0.0  ;;  %v787_v58 = vmax.f32 %v783_v50, 0.0  ;;  %v641_v59 = vadd.f32 %v4691_v39, %v640_v55 }
 0x1a2   : > { %719 = vst.msk [vmem:[#allocation2 + $0x48] sm:$0xff] %vm495_vm0, %v702_v53  ;;  %v703_v60 = vmax.f32 %v649_v54, 0.0 }
 0x1a3   : > { %791 = vst.msk [vmem:[#allocation2 + $0x8] sm:$0xff] %vm495_vm0, %v789_v56  ;;  %717 = vst.msk [vmem:[#allocation2 + $0x28] sm:$0xff] %vm495_vm0, %v700_v57  ;;  %v790_v61 = vmul.f32 %v788_v44, %v787_v58  ;;  %v701_v62 = vmax.f32 %v641_v59, 0.0 }
 0x1a4   : > { %720 = vst.msk [vmem:[#allocation2 + $0x50] sm:$0xff] %vm495_vm0, %v703_v60  ;;  %v833_v63 = vpop.f32.mrb[4].mxu1 }
 0x1a5   : > { %792 = vst.msk [vmem:[#allocation2 + $0x10] sm:$0xff] %vm495_vm0, %v790_v61  ;;  %718 = vst.msk [vmem:[#allocation2 + $0x30] sm:$0xff] %vm495_vm0, %v701_v62  ;;  %v3345_v0 = vpop.f32.mrb[4].mxu0  ;;  %v834_v1 = vadd.f32 %v4691_v39, %v833_v63  ;;  %v3369_v2 = vpop.f32.mrb[5].mxu1 }
 0x1a6   : > { %v662_v3 = vadd.f32 %v3345_v0, %v4691_v39  ;;  %v653_v4 = vpop.f32.mrb[5].mxu0  ;;  %v4713_v6 = vpop.f32.mrb[6].mxu1  ;;  %v848_v0 = vld [vmem:[#allocation2] sm:$0xff] }
 0x1a7   : > { %v654_v7 = vadd.f32 %v4691_v39, %v653_v4  ;;  %v3346_v8 = vpop.f32.mrb[6].mxu0  ;;  %v840_v9 = vmax.f32 %v834_v1, 0.0  ;;  %v3370_v10 = vpop.f32.mrb[7].mxu1 }
 0x1a8   : > { %v706_v11 = vmax.f32 %v662_v3, 0.0  ;;  %v665_v12 = vadd.f32 %v3346_v8, %v4691_v39  ;;  %v656_v13 = vpop.f32.mrb[7].mxu0  ;;  %v905_v10 = vrot.slane %v848_v0, 7 }
 0x1a9   : > { %v704_v14 = vmax.f32 %v654_v7, 0.0  ;;  %v657_v15 = vadd.f32 %v4691_v39, %v656_v13  ;;  %v843_v16 = vmul.f32 %v4711_v5, %v840_v9  ;;  %v4741_v29 = vld [vmem:[#allocation2 + $0x48] sm:$0xff]  ;;  %v1468_v13 = vld [vmem:[#allocation2 + $0xe0] sm:$0xff] }
 0x1aa   : > { %723 = vst.msk [vmem:[#allocation2 + $0x88] sm:$0xff] %vm495_vm0, %v706_v11  ;;  %v707_v17 = vmax.f32 %v665_v12, 0.0  ;;  %v4720_v18 = vld [vmem:[#allocation2 + $0x8] sm:$0xff]  ;;  %v837_v11 = vadd.f32 %v4691_v39, %v4713_v6 }
 0x1ab   : > { %721 = vst.msk [vmem:[#allocation2 + $0x68] sm:$0xff] %vm495_vm0, %v704_v14  ;;  %v705_v19 = vmax.f32 %v657_v15, 0.0  ;;  %846 = vst.msk [vmem:[#allocation2 + $0x128] sm:$0xff] %vm495_vm0, %v843_v16  ;;  %v4729_v22 = vld [vmem:[#allocation2 + $0x50] sm:$0xff]  ;;  %v4734_v25 = vld [vmem:[#allocation2 + $0x28] sm:$0xff]  ;;  %v906_v7 = vrot.slane %v4720_v18, 7 }
 0x1ac   : > { %724 = vst.msk [vmem:[#allocation2 + $0x90] sm:$0xff] %vm495_vm0, %v707_v17  ;;  %v4725_v20 = vld [vmem:[#allocation2 + $0x10] sm:$0xff]  ;;  %v4749_v33 = vpack.c.bf16 %v4729_v22, %v4741_v29  ;;  %v1472_v14 = vld [vmem:[#allocation2 + $0x100] sm:$0xff] }
 0x1ad   : > { %v4727_v21 = vld [vmem:[#allocation2 + $0x30] sm:$0xff]  ;;  %722 = vst.msk [vmem:[#allocation2 + $0x70] sm:$0xff] %vm495_vm0, %v705_v19  ;;  %v3349_v23 = vpop.f32.mrb[8].mxu0  ;;  %v970_v24 = vpack.c.bf16 %v4725_v20, %v4720_v18  ;;  %v908_v8 = vrot.slane %v4725_v20, 7  ;;  %v852_v16 = vld [vmem:[#allocation2 + $0x20] sm:$0xff]  ;;  %v1475_v19 = vld [vmem:[#allocation2 + $0x118] sm:$0xff] }
 0x1ae   : > { %v678_v26 = vadd.f32 %v3349_v23, %v4691_v39  ;;  %v669_v27 = vpop.f32.mrb[9].mxu0  ;;  %v4739_v28 = vpack.c.bf16 %v4727_v21, %v4734_v25  ;;  %v841_v23 = vmax.f32 %v837_v11, 0.0 }
 0x1af   : > { %v670_v31 = vadd.f32 %v4691_v39, %v669_v27  ;;  %v3350_v32 = vpop.f32.mrb[10].mxu0  ;;  %3373 = vmatprep.mubr.msk.bf16.mxu0 %vm495_vm0, %v970_v24  ;;  %v909_v6 = vsel %vm904_vm4, %v906_v7, %v908_v8  ;;  %v916_v8 = vrot.slane %v4741_v29, 7 }
 0x1b0   : > { %v710_v40 = vmax.f32 %v678_v26, 0.0  ;;  %v681_v41 = vadd.f32 %v3350_v32, %v4691_v39  ;;  %v672_v42 = vpop.f32.mrb[11].mxu0  ;;  %3374 = vmatmul.mubr.msk.bf16.vlgmr.msra.gmra.mrb[16].mxu0 %vm495_vm0, %v4739_v28  ;;  %v1530_v26 = vrot.slane %v1468_v13, 7 }
 0x1b1   : > { %v708_v38 = vmax.f32 %v670_v31, 0.0  ;;  %v673_v43 = vadd.f32 %v4691_v39, %v672_v42  ;;  %3377 = vmatprep.mubr.msk.bf16.mxu0 %vm495_vm0, %v4749_v33  ;;  %3390 = vmatpush3.bf16.msra.mxu0 %v1130_v30  ;;  %v4779_v53 = vld [vmem:[#allocation2 + $0x88] sm:$0xff]  ;;  %v1535_v31 = vrot.slane %v1472_v14, 7 }
 0x1b2   : > { %727 = vst.msk [vmem:[#allocation2 + $0xc8] sm:$0xff] %vm495_vm0, %v710_v40  ;;  %v711_v44 = vmax.f32 %v681_v41, 0.0  ;;  %3683 = vmatprep.subr.msk.bf16.mxu0 %vm1004_vm3, %v4754_v34  ;;  %v4767_v46 = vld [vmem:[#allocation2 + $0x68] sm:$0xff]  ;;  %v910_v41 = vrot.slane %v852_v16, 7  ;;  %v2102_v16 = vld [vmem:[#allocation2 + $0x138] sm:$0xff] }
 0x1b3   : > { %725 = vst.msk [vmem:[#allocation2 + $0xa8] sm:$0xff] %vm495_vm0, %v708_v38  ;;  %v709_v45 = vmax.f32 %v673_v43, 0.0  ;;  %v4771_v48 = vld [vmem:[#allocation2 + $0x90] sm:$0xff]  ;;  %v4871_v14 = vld [vmem:[#allocation2 + $0x128] sm:$0xff] }
 0x1b4   : > { %728 = vst.msk [vmem:[#allocation2 + $0xd0] sm:$0xff] %vm495_vm0, %v711_v44  ;;  %v4769_v47 = vld [vmem:[#allocation2 + $0x70] sm:$0xff]  ;;  %v4784_v56 = vpack.c.bf16 %v4771_v48, %v4779_v53  ;;  %v1902_v44 = vrot.slane %v1475_v19, 1  ;;  %v1329_v19 = vsel %vm1004_vm3, %v4754_v34, 0 }
 0x1b5   : > { %726 = vst.msk [vmem:[#allocation2 + $0xb0] sm:$0xff] %vm495_vm0, %v709_v45  ;;  %v3353_v49 = vpop.f32.mrb[12].mxu0  ;;  %v4776_v50 = vpack.c.bf16 %v4769_v47, %v4767_v46 }
 0x1b6   : > { %v694_v51 = vadd.f32 %v3353_v49, %v4691_v39  ;;  %v685_v52 = vpop.f32.mrb[13].mxu0 }
 0x1b7   : > { %v686_v54 = vadd.f32 %v4691_v39, %v685_v52  ;;  %v3354_v55 = vpop.f32.mrb[14].mxu0  ;;  %v913_v52 = vrot.slane %v4727_v21, 7 }
 0x1b8   : > { %v714_v57 = vmax.f32 %v694_v51, 0.0  ;;  %v697_v58 = vadd.f32 %v3354_v55, %v4691_v39  ;;  %v688_v59 = vpop.f32.mrb[15].mxu0  ;;  %3378 = vmatmul.mubr.msk.bf16.gmra.mrb[20].mxu0 %vm495_vm0, %v4776_v50  ;;  %v844_v51 = vmul.f32 %v4711_v5, %v841_v23  ;;  %v1741_v5 = vsel %vm1004_vm3, %v4676_v37, 0  ;;  %v3168_v37 = vld [vmem:[%s5400_s3 + $0x14] sm:$0xf] }
 0x1b9   : > { %v712_v60 = vmax.f32 %v686_v54, 0.0  ;;  %v689_v61 = vadd.f32 %v4691_v39, %v688_v59  ;;  %3381 = vmatprep.mubr.msk.bf16.mxu0 %vm495_vm0, %v4784_v56  ;;  %v4808_v9 = vld [vmem:[#allocation2 + $0xc8] sm:$0xff]  ;;  %v907_v39 = vsel %vm904_vm4, %v905_v10, %v906_v7  ;;  %v918_v59 = vrot.slane %v4729_v22, 7 }
 0x1ba   : > { %731 = vst.msk [vmem:[#allocation2 + $0x108] sm:$0xff] %vm495_vm0, %v714_v57  ;;  %v715_v62 = vmax.f32 %v697_v58, 0.0  ;;  %v4795_v1 = vld [vmem:[#allocation2 + $0xa8] sm:$0xff]  ;;  %v961_v43 = vpack.c.bf16 %v909_v6, %v907_v39  ;;  %v856_v57 = vld [vmem:[#allocation2 + $0x40] sm:$0xff]  ;;  %847 = vst.msk [vmem:[#allocation2 + $0x130] sm:$0xff] %vm495_vm0, %v844_v51  ;;  %v926_v51 = vrot.slane %v4779_v53, 7 }
 0x1bb   : > { %729 = vst.msk [vmem:[#allocation2 + $0xe8] sm:$0xff] %vm495_vm0, %v712_v60  ;;  %v713_v63 = vmax.f32 %v689_v61, 0.0  ;;  %v4799_v3 = vld [vmem:[#allocation2 + $0xd0] sm:$0xff]  ;;  %v915_v10 = vrot.slane %v856_v57, 7  ;;  %v919_v39 = vsel %vm904_vm4, %v916_v8, %v918_v59 }
 0x1bc   : > { %732 = vst.msk [vmem:[#allocation2 + $0x110] sm:$0xff] %vm495_vm0, %v715_v62  ;;  %v4797_v2 = vld [vmem:[#allocation2 + $0xb0] sm:$0xff]  ;;  %v4814_v12 = vpack.c.bf16 %v4799_v3, %v4808_v9  ;;  %v911_v62 = vrot.slane %v4734_v25, 7 }
 0x1bd   : > { %730 = vst.msk [vmem:[#allocation2 + $0xf0] sm:$0xff] %vm495_vm0, %v713_v63  ;;  %v4804_v4 = vpack.c.bf16 %v4797_v2, %v4795_v1 }
 0x1be   : > { %v914_v13 = vsel %vm904_vm4, %v911_v62, %v913_v52  ;;  %v912_v6 = vsel %vm904_vm4, %v910_v41, %v911_v62  ;;  %v928_v41 = vrot.slane %v4771_v48, 7 }
 0x1bf   : > { %v4880_v23 = vpack.c.bf16 %v914_v13, %v912_v6  ;;  %v931_v13 = vrot.slane %v4795_v1, 7 }
 0x1c0   : > { %3382 = vmatmul.mubr.msk.bf16.gmra.mrb[24].mxu0 %vm495_vm0, %v4804_v4 }
 0x1c1   : > { %3385 = vmatprep.mubr.msk.bf16.mxu0 %vm495_vm0, %v4814_v12  ;;  %v4820_v15 = vld [vmem:[#allocation2 + $0x108] sm:$0xff] }
 0x1c2   : > { %v4822_v17 = vld [vmem:[#allocation2 + $0xe8] sm:$0xff]  ;;  %v1536_v32 = vrot.slane %v4820_v15, 7  ;;  %v1899_v58 = vrot.slane %v4820_v15, 1 }
 0x1c3   : > { %v941_v24 = vrot.slane %v4822_v17, 7  ;;  %v4827_v27 = vld [vmem:[#allocation2 + $0x110] sm:$0xff] }
 0x1c4   : > { %v4829_v30 = vld [vmem:[#allocation2 + $0xf0] sm:$0xff]  ;;  %v1538_v40 = vrot.slane %v4827_v27, 7  ;;  %v1900_v49 = vrot.slane %v4827_v27, 1  ;;  %v1537_v61 = vsel %vm904_vm4, %v1535_v31, %v1536_v32  ;;  %v2526_v31 = vrot.slane %v4871_v14, 1 }
 0x1c5   : > { %v943_v42 = vrot.slane %v4829_v30, 7  ;;  %v4836_v38 = vpack.c.bf16 %v4829_v30, %v4822_v17  ;;  %v1532_v54 = vsel %vm904_vm4, %v1530_v26, %v941_v24  ;;  %v860_v26 = vld [vmem:[#allocation2 + $0x60] sm:$0xff] }
 0x1c6   : > { %v1539_v45 = vsel %vm904_vm4, %v1536_v32, %v1538_v40  ;;  %v1901_v0 = vsel %vm1237_vm5, %v1899_v58, %v1900_v49  ;;  %v1903_v7 = vsel %vm1237_vm5, %v1900_v49, %v1902_v44  ;;  %v2529_v32 = vrot.slane %v2102_v16, 1 }
 0x1c7   : > { %v1534_v55 = vsel %vm904_vm4, %v941_v24, %v943_v42  ;;  %v4855_v63 = vpack.c.bf16 %v1539_v45, %v1537_v61  ;;  %v4866_v11 = vpack.c.bf16 %v1903_v7, %v1901_v0  ;;  %v917_v24 = vsel %vm904_vm4, %v915_v10, %v916_v8  ;;  %v864_v42 = vld [vmem:[#allocation2 + $0x80] sm:$0xff] }
 0x1c8   : > { %3386 = vmatmul.mubr.msk.bf16.gmra.mrb[28].mxu0 %vm495_vm0, %v4836_v38  ;;  %v4848_v60 = vpack.c.bf16 %v1534_v55, %v1532_v54  ;;  %v923_v40 = vrot.slane %v4769_v47, 7  ;;  %v921_v44 = vrot.slane %v4767_v46, 7  ;;  %v1955_v45 = vsel %vm1004_vm3, %v3168_v37, 0  ;;  %v4901_v54 = vld [vmem:[%s5400_s3 + $0x18] sm:$0xf]  ;;  %v868_v0 = vld [vmem:[#allocation2 + $0xa0] sm:$0xff] }
 0x1c9   : > { %3391 = vmatprep.mubr.msk.bf16.mxu0 %vm495_vm0, %v961_v43  ;;  %v4887_v43 = vld [vmem:[#allocation2 + $0x130] sm:$0xff]  ;;  %v920_v49 = vrot.slane %v860_v26, 7  ;;  %v925_v52 = vrot.slane %v864_v42, 7  ;;  %v933_v7 = vrot.slane %v4797_v2, 7  ;;  %v872_v10 = vld [vmem:[#allocation2 + $0xc0] sm:$0xff]  ;;  %v930_v16 = vrot.slane %v868_v0, 7 }
 0x1ca   : > { %3439 = vmatprep.mubr.msk.bf16.mxu1 %vm495_vm0, %v4848_v60  ;;  %v2527_v34 = vrot.slane %v4887_v43, 1  ;;  %v924_v58 = vsel %vm904_vm4, %v921_v44, %v923_v40  ;;  %v935_v6 = vrot.slane %v872_v10, 7  ;;  %v1238_v40 = vrot.slane %v4720_v18, 1 }
 0x1cb   : > { %3440 = vmatmul.mubr.msk.bf16.vlgmr.msra.gmra.mrb[8].mxu1 %vm495_vm0, %v4855_v63  ;;  %v922_v61 = vsel %vm904_vm4, %v920_v49, %v921_v44  ;;  %v927_v62 = vsel %vm904_vm4, %v925_v52, %v926_v51  ;;  %v1239_v42 = vrot.slane %v4725_v20, 1  ;;  %v1244_v18 = vrot.slane %v4727_v21, 1 }
 0x1cc   : > { %3444 = vmatpush3.bf16.msra.mxu1 %v1741_v5  ;;  %3445 = vmatprep.mubr.msk.bf16.mxu1 %vm495_vm0, %v4739_v28  ;;  %v4885_v28 = vpack.c.bf16 %v919_v39, %v917_v24  ;;  %v4906_v55 = vsel %vm1237_vm5, %v2526_v31, %v2527_v34  ;;  %v4909_v57 = vsel %vm1237_vm5, %v2527_v34, %v2529_v32  ;;  %v936_v39 = vrot.slane %v4808_v9, 7 }
 0x1cd   : > { %3687 = vmatprep.subr.msk.bf16.mxu1 %vm1004_vm3, %v3168_v37  ;;  %v2554_v59 = vpack.c.bf16 %v4909_v57, %v4906_v55  ;;  %v4922_v5 = vpack.c.bf16 %v924_v58, %v922_v61  ;;  %v938_v37 = vrot.slane %v4799_v3, 7  ;;  %v934_v24 = vsel %vm904_vm4, %v931_v13, %v933_v7  ;;  %v1455_v7 = vld [vmem:[#allocation2 + $0x78] sm:$0xff] }
 0x1ce   : > { %v932_v31 = vsel %vm904_vm4, %v930_v16, %v931_v13  ;;  %v937_v34 = vsel %vm904_vm4, %v935_v6, %v936_v39  ;;  %v1240_v49 = vsel %vm1237_vm5, %v1238_v40, %v1239_v42  ;;  %v1243_v52 = vrot.slane %v4734_v25, 1 }
 0x1cf   : > { %v939_v26 = vsel %vm904_vm4, %v936_v39, %v938_v37  ;;  %v1249_v0 = vrot.slane %v4729_v22, 1  ;;  %v4968_v10 = vpack.c.bf16 %v4827_v27, %v4820_v15  ;;  %v1248_v25 = vrot.slane %v4741_v29, 1  ;;  %v867_v27 = vld [vmem:[#allocation2 + $0x98] sm:$0xff] }
 0x1d0   : > { %3392 = vmatmul.mubr.msk.bf16.vlgmr.msra.gmra.mrb[16].mxu0 %vm495_vm0, %v4880_v23  ;;  %v4947_v44 = vpack.c.bf16 %v939_v26, %v937_v34  ;;  %v1866_v61 = vsel %vm1237_vm5, %v1243_v52, %v1244_v18  ;;  %v1254_v13 = vrot.slane %v4769_v47, 1  ;;  %v1877_v22 = vrot.slane %v1455_v7, 1  ;;  %v1463_v26 = vld [vmem:[#allocation2 + $0xb8] sm:$0xff]  ;;  %v3195_v7 = vld [vmem:[%s5400_s3 + $0x20] sm:$0xf] }
 0x1d1   : > { %3395 = vmatprep.mubr.msk.bf16.mxu0 %vm495_vm0, %v4885_v28  ;;  %3408 = vmatpush3.bf16.msra.mxu0 %v1329_v19  ;;  %v851_v19 = vld [vmem:[#allocation2 + $0x18] sm:$0xff]  ;;  %v1250_v16 = vsel %vm1237_vm5, %v1248_v25, %v1249_v0  ;;  %v1253_v15 = vrot.slane %v4767_v46, 1  ;;  %v1259_v47 = vrot.slane %v4771_v48, 1  ;;  %v1258_v46 = vrot.slane %v4779_v53, 1 }
 0x1d2   : > { %3684 = vmatprep.subr.msk.bf16.mxu0 %vm1004_vm3, %v4664_v35  ;;  %v929_v35 = vsel %vm904_vm4, %v926_v51, %v928_v41  ;;  %v1241_v32 = vrot.slane %v851_v19, 1  ;;  %v4944_v41 = vpack.c.bf16 %v934_v24, %v932_v31  ;;  %v1878_v19 = vsel %vm1237_vm5, %v1254_v13, %v1877_v22  ;;  %v3186_v48 = vld [vmem:[%s5400_s3 + $0x1c] sm:$0xf] }
 0x1d3   : > { %3446 = vmatmul.mubr.msk.bf16.vlgmr.msra.gmra.mrb[12].mxu1 %vm495_vm0, %v4749_v33  ;;  %v4926_v8 = vpack.c.bf16 %v929_v35, %v927_v62  ;;  %v859_v35 = vld [vmem:[#allocation2 + $0x58] sm:$0xff]  ;;  %v1876_v29 = vsel %vm1237_vm5, %v1253_v15, %v1254_v13  ;;  %v1261_v24 = vrot.slane %v867_v27, 1  ;;  %v2218_v31 = vsel %vm1004_vm3, %v4901_v54, 0  ;;  %v5116_v27 = vld [vmem:[%s5403_s17] ss:$0 sm:$0xff]  ;;  %s3946_s17 = sshll.u32 %s4105_s20, 4  ;;  %s3947_s17 = int_to_ptr.vmem [resolvable:$false] %s3946_s17 }
 0x1d4   : > { %3462 = vmatpush3.bf16.msra.mxu1 %v1955_v45  ;;  %3449 = vmatprep.mubr.msk.bf16.mxu1 %vm495_vm0, %v4776_v50  ;;  %v1447_v45 = vld [vmem:[#allocation2 + $0x38] sm:$0xff]  ;;  %v1242_v51 = vsel %vm1237_vm5, %v1239_v42, %v1241_v32  ;;  %v1251_v21 = vrot.slane %v859_v35, 1  ;;  %v4991_v32 = vpack.c.bf16 %v1878_v19, %v1876_v29  ;;  %v1264_v40 = vrot.slane %v4797_v2, 1  ;;  %s3948_s19 = scalar_lea.vmem %s3947_s17, 4096  ;;  %p3949_p12 = scmp.lt.s32.totalorder %s5216_s6, %s3947_s17 }
 0x1d5   : > { %3688 = vmatprep.subr.msk.bf16.mxu1 %vm1004_vm3, %v4901_v54  ;;  %v1867_v20 = vrot.slane %v1447_v45, 1  ;;  %v1294_v58 = vpack.c.bf16 %v1242_v51, %v1240_v49  ;;  %v1887_v42 = vrot.slane %v1463_v26, 1  ;;  %v1262_v53 = vsel %vm1237_vm5, %v1259_v47, %v1261_v24  ;;  %v875_v34 = vld [vmem:[#allocation2 + $0xd8] sm:$0xff]  ;;  %p3950_p11 = scmp.lt.s32.totalorder %s3948_s19, %s3942_s30 }
 0x1d6   : > { %v1252_v39 = vsel %vm1237_vm5, %v1249_v0, %v1251_v21  ;;  %v1263_v54 = vrot.slane %v4795_v1, 1  ;;  %v1269_v51 = vrot.slane %v4799_v3, 1  ;;  %v1268_v1 = vrot.slane %v4808_v9, 1 }
 0x1d7   : > { %v1868_v62 = vsel %vm1237_vm5, %v1244_v18, %v1867_v20  ;;  %v4979_v6 = vpack.c.bf16 %v1252_v39, %v1250_v16  ;;  %v1888_v49 = vsel %vm1237_vm5, %v1264_v40, %v1887_v42  ;;  %v1271_v18 = vrot.slane %v875_v34, 1  ;;  %v1471_v20 = vld [vmem:[#allocation2 + $0xf8] sm:$0xff]  ;;  %p3951_p2 = por %p3950_p11, %p3949_p12 }
 0x1d8   : > { %3396 = vmatmul.mubr.msk.bf16.gmra.mrb[20].mxu0 %vm495_vm0, %v4922_v5  ;;  %v1920_v37 = vpack.c.bf16 %v1868_v62, %v1866_v61  ;;  %v1886_v2 = vsel %vm1237_vm5, %v1263_v54, %v1264_v40  ;;  %v1897_v35 = vrot.slane %v1471_v20, 1  ;;  %v1270_v3 = vsel %vm1237_vm5, %v1268_v1, %v1269_v51 }
 0x1d9   : > { %3399 = vmatprep.mubr.msk.bf16.mxu0 %vm495_vm0, %v4926_v8  ;;  %v1924_v52 = vpack.c.bf16 %v1888_v49, %v1886_v2  ;;  %v1272_v61 = vsel %vm1237_vm5, %v1269_v51, %v1271_v18  ;;  %v1273_v62 = vrot.slane %v4822_v17, 1  ;;  %v2368_v17 = vsel %vm1004_vm3, %v3186_v48, 0  ;;  %p3952_p1 = pnand %p3951_p2, %p3945_p0 }
 0x1da   : > { %v1300_v0 = vpack.c.bf16 %v1272_v61, %v1270_v3  ;;  %v2165_v25 = vrot.slane %v4887_v43, 7 }
 0x1db   : > { %3450 = vmatmul.mubr.msk.bf16.gmra.mrb[16].mxu1 %vm495_vm0, %v4784_v56 }
 0x1dc   : > { %3453 = vmatprep.mubr.msk.bf16.mxu1 %vm495_vm0, %v4804_v4 }
 0x1e0   : > { %3400 = vmatmul.mubr.msk.bf16.gmra.mrb[24].mxu0 %vm495_vm0, %v4944_v41 }
 0x1e1   : > { %3403 = vmatprep.mubr.msk.bf16.mxu0 %vm495_vm0, %v4947_v44 }
 0x1e3   : > { %3454 = vmatmul.mubr.msk.bf16.gmra.mrb[20].mxu1 %vm495_vm0, %v4814_v12 }
 0x1e4   : > { %3457 = vmatprep.mubr.msk.bf16.mxu1 %vm495_vm0, %v4836_v38 }
 0x1e8   : > { %3404 = vmatmul.mubr.msk.bf16.gmra.mrb[28].mxu0 %vm495_vm0, %v4848_v60 }
 0x1e9   : > { %3409 = vmatprep.mubr.msk.bf16.mxu0 %vm495_vm0, %v1294_v58  ;;  %v1274_v58 = vrot.slane %v4829_v30, 1 }
 0x1eb   : > { %3458 = vmatmul.mubr.msk.bf16.gmra.mrb[8].mxu1 %vm495_vm0, %v4968_v10  ;;  %v1896_v21 = vsel %vm1237_vm5, %v1273_v62, %v1274_v58  ;;  %v1898_v9 = vsel %vm1237_vm5, %v1274_v58, %v1897_v35 }
 0x1ec   : > { %3463 = vmatprep.mubr.msk.bf16.mxu1 %vm495_vm0, %v1920_v37  ;;  %v1926_v30 = vpack.c.bf16 %v1898_v9, %v1896_v21 }
 0x1f0   : > { %3410 = vmatmul.mubr.msk.bf16.vlgmr.msra.gmra.mrb[16].mxu0 %vm495_vm0, %v1920_v37 }
 0x1f1   : > { %3413 = vmatprep.mubr.msk.bf16.mxu0 %vm495_vm0, %v4979_v6  ;;  %3426 = vmatpush3.bf16.msra.mxu0 %v4670_v36  ;;  %v1260_v36 = vsel %vm1237_vm5, %v1258_v46, %v1259_v47 }
 0x1f2   : > { %v5005_v45 = vpack.c.bf16 %v1262_v53, %v1260_v36 }
 0x1f3   : > { %3464 = vmatmul.mubr.msk.bf16.vlgmr.msra.gmra.mrb[12].mxu1 %vm495_vm0, %v4979_v6 }
 0x1f4   : > { %3480 = vmatpush3.bf16.msra.mxu1 %v2218_v31  ;;  %3467 = vmatprep.mubr.msk.bf16.mxu1 %vm495_vm0, %v4991_v32 }
 0x1f5   : > { %3689 = vmatprep.subr.msk.bf16.mxu1 %vm1004_vm3, %v3186_v48 }
 0x1f8   : > { %3414 = vmatmul.mubr.msk.bf16.gmra.mrb[20].mxu0 %vm495_vm0, %v4991_v32 }
 0x1f9   : > { %3417 = vmatprep.mubr.msk.bf16.mxu0 %vm495_vm0, %v5005_v45 }
 0x1fb   : > { %3468 = vmatmul.mubr.msk.bf16.gmra.mrb[16].mxu1 %vm495_vm0, %v5005_v45 }
 0x1fc   : > { %3471 = vmatprep.mubr.msk.bf16.mxu1 %vm495_vm0, %v1924_v52 }
 0x200   : > { %3418 = vmatmul.mubr.msk.bf16.gmra.mrb[24].mxu0 %vm495_vm0, %v1924_v52 }
 0x201   : > { %3421 = vmatprep.mubr.msk.bf16.mxu0 %vm495_vm0, %v1300_v0 }
 0x203   : > { %3472 = vmatmul.mubr.msk.bf16.gmra.mrb[20].mxu1 %vm495_vm0, %v1300_v0 }
 0x204   : > { %3475 = vmatprep.mubr.msk.bf16.mxu1 %vm495_vm0, %v1926_v30 }
 0x208   : > { %3422 = vmatmul.mubr.msk.bf16.gmra.mrb[28].mxu0 %vm495_vm0, %v1926_v30 }
 0x209   : > { %3427 = vmatprep.mubr.msk.bf16.mxu0 %vm495_vm0, %v4880_v23  ;;  %v2099_v23 = vld [vmem:[#allocation2 + $0x120] sm:$0xff] }
 0x20b   : > { %3476 = vmatmul.mubr.msk.bf16.gmra.mrb[8].mxu1 %vm495_vm0, %v4866_v11 }
 0x20c   : > { %3481 = vmatprep.mubr.msk.bf16.mxu1 %vm495_vm0, %v4885_v28 }
 0x210   : > { %3428 = vmatmul.mubr.msk.bf16.vlgmr.msra.gmra.mrb[16].mxu0 %vm495_vm0, %v4885_v28  ;;  %v2162_v28 = vrot.slane %v2099_v23, 7 }
 0x211   : > { %3431 = vmatprep.mubr.msk.bf16.mxu0 %vm495_vm0, %v4922_v5 }
 0x213   : > { %3482 = vmatmul.mubr.msk.bf16.vlgmr.msra.gmra.mrb[12].mxu1 %vm495_vm0, %v4922_v5  ;;  %v2163_v5 = vrot.slane %v4871_v14, 7 }
 0x214   : > { %3498 = vmatpush3.bf16.msra.mxu1 %v2368_v17  ;;  %3485 = vmatprep.mubr.msk.bf16.mxu1 %vm495_vm0, %v4926_v8 }
 0x215   : > { %3690 = vmatprep.subr.msk.bf16.mxu1 %vm1004_vm3, %v3195_v7 }
 0x218   : > { %3432 = vmatmul.mubr.msk.bf16.gmra.mrb[20].mxu0 %vm495_vm0, %v4926_v8  ;;  %v2164_v8 = vsel %vm904_vm4, %v2162_v28, %v2163_v5 }
 0x219   : > { %3435 = vmatprep.mubr.msk.bf16.mxu0 %vm495_vm0, %v4944_v41 }
 0x21b   : > { %3486 = vmatmul.mubr.msk.bf16.gmra.mrb[16].mxu1 %vm495_vm0, %v4944_v41  ;;  %v2166_v41 = vsel %vm904_vm4, %v2163_v5, %v2165_v25 }
 0x21c   : > { %3489 = vmatprep.mubr.msk.bf16.mxu1 %vm495_vm0, %v4947_v44  ;;  %v2190_v37 = vpack.c.bf16 %v2166_v41, %v2164_v8 }
 0x220   : > { %3436 = vmatmul.mubr.msk.bf16.gmra.mrb[24].mxu0 %vm495_vm0, %v4947_v44  ;;  %v2582_v44 = vsel %vm1004_vm3, %v3195_v7, 0 }
 0x223   : > { %3490 = vmatmul.mubr.msk.bf16.gmra.mrb[20].mxu1 %vm495_vm0, %v4848_v60 }
 0x224   : > { %3493 = vmatprep.mubr.msk.bf16.mxu1 %vm495_vm0, %v4855_v63 }
 0x22b   : > { %3494 = vmatmul.mubr.msk.bf16.gmra.mrb[8].mxu1 %vm495_vm0, %v2190_v37 }
 0x22c   : > { %3499 = vmatprep.mubr.msk.bf16.mxu1 %vm495_vm0, %v4749_v33  ;;  %v2340_v33 = vpack.c.bf16 %v4887_v43, %v4871_v14 }
 0x233   : > { %3500 = vmatmul.mubr.msk.bf16.vlgmr.msra.gmra.mrb[12].mxu1 %vm495_vm0, %v4776_v50  ;;  %v2744_v50 = vld [vmem:[%s5402_s21] sm:$0xf]  ;;  %s5223_s21 = scalar_lea.hbm %s5406_s12, %s3218_s28 }
 0x234   : > { %3516 = vmatpush3.bf16.msra.mxu1 %v2582_v44  ;;  %3503 = vmatprep.mubr.msk.bf16.mxu1 %vm495_vm0, %v4784_v56  ;;  %v2777_v56 = vsel %vm1004_vm3, %v2744_v50, 0 }
 0x235   : > { %3691 = vmatprep.subr.msk.bf16.mxu0 %vm1004_vm3, %v2744_v50 }
 0x236   : > { %3534 = vmatpush3.bf16.msra.mxu0 %v2777_v56 }
 0x23b   : > { %3504 = vmatmul.mubr.msk.bf16.gmra.mrb[16].mxu1 %vm495_vm0, %v4804_v4 }
 0x23c   : > { %3507 = vmatprep.mubr.msk.bf16.mxu1 %vm495_vm0, %v4814_v12 }
 0x243   : > { %3508 = vmatmul.mubr.msk.bf16.gmra.mrb[20].mxu1 %vm495_vm0, %v4836_v38 }
 0x244   : > { %3511 = vmatprep.mubr.msk.bf16.mxu1 %vm495_vm0, %v4968_v10 }
 0x24b   : > { %3512 = vmatmul.mubr.msk.bf16.gmra.mrb[8].mxu1 %vm495_vm0, %v2340_v33 }
 0x24c   : > { %3517 = vmatprep.mubr.msk.bf16.mxu1 %vm495_vm0, %v4979_v6 }
 0x253   : > { %3518 = vmatmul.mubr.msk.bf16.vlgmr.msra.gmra.mrb[12].mxu1 %vm495_vm0, %v4991_v32 }
 0x254   : > { %3521 = vmatprep.mubr.msk.bf16.mxu1 %vm495_vm0, %v5005_v45 }
 0x25b   : > { %3522 = vmatmul.mubr.msk.bf16.gmra.mrb[16].mxu1 %vm495_vm0, %v1924_v52 }
 0x25c   : > { %3525 = vmatprep.mubr.msk.bf16.mxu1 %vm495_vm0, %v1300_v0 }
 0x263   : > { %3526 = vmatmul.mubr.msk.bf16.gmra.mrb[20].mxu1 %vm495_vm0, %v1926_v30 }
 0x264   : > { %3529 = vmatprep.mubr.msk.bf16.mxu1 %vm495_vm0, %v4866_v11 }
 0x26b   : > { %3530 = vmatmul.mubr.msk.bf16.gmra.mrb[8].mxu1 %vm495_vm0, %v2554_v59 }
 0x2db   : > { %v5105_v4 = vpop.f32.mrb[28].mxu0 }
 0x2dc   : > { %v5107_v12 = vpop.f32.mrb[29].mxu0 }
 0x2dd   : > { %v5109_v38 = vpop.f32.mrb[30].mxu0 }
 0x2de   : > { %v5111_v60 = vpop.f32.mrb[31].mxu0 }
 0x2e3   : > { %v3429_v63 = vpop.f32.mrb[16].mxu0 }
 0x2e4   : > { %v1627_v11 = vpop.f32.mrb[17].mxu0 }
 0x2e5   : > { %v3430_v14 = vpop.f32.mrb[18].mxu0 }
 0x2e6   : > { %v1630_v43 = vpop.f32.mrb[19].mxu0 }
 0x2eb   : > { %v3433_v55 = vpop.f32.mrb[20].mxu0 }
 0x2ec   : > { %v1643_v57 = vpop.f32.mrb[21].mxu0 }
 0x2ed   : > { %v3434_v59 = vpop.f32.mrb[22].mxu0 }
 0x2ee   : > { %v1646_v10 = vpop.f32.mrb[23].mxu0 }
 0x2f3   : > { %v3437_v13 = vpop.f32.mrb[24].mxu0 }
 0x2f4   : > { %v1659_v22 = vpop.f32.mrb[25].mxu0 }
 0x2f5   : > { %v3438_v16 = vpop.f32.mrb[26].mxu0 }
 0x2f6   : > { %v1662_v39 = vpop.f32.mrb[27].mxu0 }
 0x326   : > { %v3519_v15 = vpop.f32.mrb[12].mxu1 }
 0x327   : > { %v3553_v6 = vadd.f32 %v3519_v15, %v3429_v63  ;;  %v2618_v29 = vpop.f32.mrb[13].mxu1 }
 0x328   : > { %v3554_v19 = vadd.f32 %v2618_v29, %v1627_v11  ;;  %v3520_v47 = vpop.f32.mrb[14].mxu1 }
 0x329   : > { %v2706_v24 = vadd.f32 %v3553_v6, %v5116_v27  ;;  %v3555_v26 = vadd.f32 %v3520_v47, %v3430_v14  ;;  %v2621_v31 = vpop.f32.mrb[15].mxu1 }
 0x32a   : > { %v2704_v46 = vadd.f32 %v3554_v19, %v5116_v27  ;;  %v3556_v32 = vadd.f32 %v2621_v31, %v1630_v43 }
 0x32b   : > { %v2707_v48 = vadd.f32 %v3555_v26, %v5116_v27  ;;  %v2722_v42 = vmax.f32 %v2706_v24, 0.0 }
 0x32c   : > { %v2705_v40 = vadd.f32 %v3556_v32, %v5116_v27  ;;  %v2720_v53 = vmax.f32 %v2704_v46, 0.0 }
 0x32d   : > { %v2723_v36 = vmax.f32 %v2707_v48, 0.0 }
 0x32e   : > { %v2721_v54 = vmax.f32 %v2705_v40, 0.0  ;;  %v3523_v34 = vpop.f32.mrb[16].mxu1 }
 0x32f   : > { %v2737_v45 = vpack.c.bf16 %v2723_v36, %v2722_v42  ;;  %v3557_v2 = vadd.f32 %v3523_v34, %v3433_v55  ;;  %v2634_v49 = vpop.f32.mrb[17].mxu1 }
 0x330   : > { %v2736_v51 = vpack.c.bf16 %v2721_v54, %v2720_v53  ;;  %v3558_v18 = vadd.f32 %v2634_v49, %v1643_v57  ;;  %v3524_v20 = vpop.f32.mrb[18].mxu1  ;;  %v3836_v53 = vld [vmem:[%s4505_s25 + $0x10] sm:$0xff] }
 0x331   : > { %v2710_v1 = vadd.f32 %v3557_v2, %v5116_v27  ;;  %v3559_v52 = vadd.f32 %v3524_v20, %v3434_v59  ;;  %v2637_v58 = vpop.f32.mrb[19].mxu1  ;;  %v3837_v2 = vld [vmem:[%s4505_s25] sm:$0xff]  ;;  %v3838_v20 = vld [vmem:[%s4505_s25 + $0x18] sm:$0xff] }
 0x332   : > { %v2708_v35 = vadd.f32 %v3558_v18, %v5116_v27  ;;  %v3560_v3 = vadd.f32 %v2637_v58, %v1646_v10  ;;  %3535 = vmatprep.mubr.msk.bf16.mxu0 %vm495_vm0, %v2736_v51  ;;  %v3839_v58 = vld [vmem:[%s4505_s25 + $0x8] sm:$0xff] }
 0x333   : > { %v2711_v61 = vadd.f32 %v3559_v52, %v5116_v27  ;;  %3536 = vmatmul.mubr.msk.bf16.vlgmr.msra.gmra.mrb[32].mxu0 %vm495_vm0, %v2737_v45  ;;  %v2726_v0 = vmax.f32 %v2710_v1, 0.0 }
 0x334   : > { %v2709_v62 = vadd.f32 %v3560_v3, %v5116_v27  ;;  %v2724_v9 = vmax.f32 %v2708_v35, 0.0 }
 0x335   : > { %v2727_v21 = vmax.f32 %v2711_v61, 0.0 }
 0x336   : > { %v2725_v30 = vmax.f32 %v2709_v62, 0.0  ;;  %v3527_v17 = vpop.f32.mrb[20].mxu1 }
 0x337   : > { %v2739_v7 = vpack.c.bf16 %v2727_v21, %v2726_v0  ;;  %v3561_v23 = vadd.f32 %v3527_v17, %v3437_v13  ;;  %v2650_v28 = vpop.f32.mrb[21].mxu1  ;;  %v3840_v17 = vld [vmem:[%s4505_s25 + $0x30] sm:$0xff] }
 0x338   : > { %v2738_v5 = vpack.c.bf16 %v2725_v30, %v2724_v9  ;;  %v3562_v25 = vadd.f32 %v2650_v28, %v1659_v22  ;;  %v3528_v8 = vpop.f32.mrb[22].mxu1 }
 0x339   : > { %v2714_v41 = vadd.f32 %v3561_v23, %v5116_v27  ;;  %v3563_v37 = vadd.f32 %v3528_v8, %v3438_v16  ;;  %v2653_v44 = vpop.f32.mrb[23].mxu1 }
 0x33a   : > { %v2712_v33 = vadd.f32 %v3562_v25, %v5116_v27  ;;  %v3564_v50 = vadd.f32 %v2653_v44, %v1662_v39  ;;  %3539 = vmatprep.mubr.msk.bf16.mxu0 %vm495_vm0, %v2738_v5  ;;  %v3841_v5 = vld [vmem:[%s4505_s25 + $0x20] sm:$0xff] }
 0x33b   : > { %v2715_v56 = vadd.f32 %v3563_v37, %v5116_v27  ;;  %3540 = vmatmul.mubr.msk.bf16.gmra.mrb[36].mxu0 %vm495_vm0, %v2739_v7  ;;  %v2730_v11 = vmax.f32 %v2714_v41, 0.0  ;;  %v3842_v37 = vld [vmem:[%s4505_s25 + $0x38] sm:$0xff] }
 0x33c   : > { %v2713_v63 = vadd.f32 %v3564_v50, %v5116_v27  ;;  %v2728_v43 = vmax.f32 %v2712_v33, 0.0  ;;  %v3843_v50 = vld [vmem:[%s4505_s25 + $0x28] sm:$0xff] }
 0x33d   : > { %v2731_v14 = vmax.f32 %v2715_v56, 0.0 }
 0x33e   : > { %v2729_v55 = vmax.f32 %v2713_v63, 0.0  ;;  %v3531_v57 = vpop.f32.mrb[8].mxu1 }
 0x33f   : > { %v2741_v59 = vpack.c.bf16 %v2731_v14, %v2730_v11  ;;  %v3565_v10 = vadd.f32 %v3531_v57, %v5105_v4  ;;  %v2666_v13 = vpop.f32.mrb[9].mxu1 }
 0x340   : > { %v2740_v22 = vpack.c.bf16 %v2729_v55, %v2728_v43  ;;  %v3566_v16 = vadd.f32 %v2666_v13, %v5107_v12  ;;  %v3532_v39 = vpop.f32.mrb[10].mxu1 }
 0x341   : > { %v2718_v15 = vadd.f32 %v3565_v10, %v5116_v27  ;;  %v3567_v6 = vadd.f32 %v3532_v39, %v5109_v38  ;;  %v2669_v29 = vpop.f32.mrb[11].mxu1  ;;  %v3844_v10 = vld [vmem:[%s4505_s25 + $0x50] sm:$0xff]  ;;  %v3845_v39 = vld [vmem:[%s4505_s25 + $0x40] sm:$0xff] }
 0x342   : > { %v2716_v19 = vadd.f32 %v3566_v16, %v5116_v27  ;;  %v3568_v47 = vadd.f32 %v2669_v29, %v5111_v60  ;;  %3543 = vmatprep.mubr.msk.bf16.mxu0 %vm495_vm0, %v2740_v22  ;;  %v5149_v60 = vld [vmem:[%s5404_s29] ss:$0 sm:$0xff] }
 0x343   : > { %v2719_v24 = vadd.f32 %v3567_v6, %v5116_v27  ;;  %3544 = vmatmul.mubr.msk.bf16.gmra.mrb[40].mxu0 %vm495_vm0, %v2741_v59  ;;  %v2734_v12 = vmax.f32 %v2718_v15, 0.0 }
 0x344   : > { %v2717_v4 = vadd.f32 %v3568_v47, %v5116_v27  ;;  %v2732_v31 = vmax.f32 %v2716_v19, 0.0  ;;  %v3846_v19 = vld [vmem:[%s4505_s25 + $0x58] sm:$0xff] }
 0x345   : > { %v2735_v26 = vmax.f32 %v2719_v24, 0.0 }
 0x346   : > { %v2733_v46 = vmax.f32 %v2717_v4, 0.0  ;;  %v3847_v4 = vld [vmem:[%s4505_s25 + $0x48] sm:$0xff] }
 0x347   : > { %v2743_v38 = vpack.c.bf16 %v2735_v26, %v2734_v12 }
 0x348   : > { %v2742_v32 = vpack.c.bf16 %v2733_v46, %v2732_v31 }
 0x34a   : > { %3547 = vmatprep.mubr.msk.bf16.mxu0 %vm495_vm0, %v2742_v32 }
 0x34b   : > { %3548 = vmatmul.mubr.msk.bf16.gmra.mrb[44].mxu0 %vm495_vm0, %v2743_v38 }
 0x406   : > { %v3537_v48 = vpop.f32.mrb[32].mxu0 }
 0x407   : > { %v2822_v27 = vadd.f32 %v3537_v48, %v5149_v60  ;;  %v2813_v40 = vpop.f32.mrb[33].mxu0 }
 0x408   : > { %v2814_v42 = vadd.f32 %v5149_v60, %v2813_v40  ;;  %v3538_v36 = vpop.f32.mrb[34].mxu0  ;;  %v3848_v40 = vld [vmem:[%s4505_s25 + $0x70] sm:$0xff] }
 0x409   : > { %v2878_v54 = vadd.f32 %v3836_v53, %v2822_v27  ;;  %v2825_v34 = vadd.f32 %v3538_v36, %v5149_v60  ;;  %v2816_v45 = vpop.f32.mrb[35].mxu0 }
 0x40a   : > { %v2876_v49 = vadd.f32 %v3837_v2, %v2814_v42  ;;  %v2817_v51 = vadd.f32 %v5149_v60, %v2816_v45 }
 0x40b   : > { %v2894_v18 = vmax.f32 %v2878_v54, 0.0  ;;  %v2879_v1 = vadd.f32 %v3838_v20, %v2825_v34  ;;  %v3849_v54 = vld [vmem:[%s4505_s25 + $0x60] sm:$0xff]  ;;  %v3851_v20 = vld [vmem:[%s4505_s25 + $0x68] sm:$0xff] }
 0x40c   : > { %v2892_v52 = vmax.f32 %v2876_v49, 0.0  ;;  %v2877_v35 = vadd.f32 %v3839_v58, %v2817_v51  ;;  %v3850_v49 = vld [vmem:[%s4505_s25 + $0x78] sm:$0xff]  ;;  %s2925_s25 = scalar_lea.sflag [#allocation5], %s4499_s7 }
 0x40d   : > { %2910 = vst.msk [vmem:[%s5161_s13 + $0x10] sm:$0xff] %vm578_vm2, %v2894_v18  ;;  %v2895_v3 = vmax.f32 %v2879_v1, 0.0 }
 0x40e   : > { %2908 = vst.msk [vmem:[%s5161_s13] sm:$0xff] %vm578_vm2, %v2892_v52  ;;  %v2893_v61 = vmax.f32 %v2877_v35, 0.0  ;;  %v3541_v62 = vpop.f32.mrb[36].mxu0 }
 0x40f   : > { %2911 = vst.msk [vmem:[%s5161_s13 + $0x18] sm:$0xff] %vm578_vm2, %v2895_v3  ;;  %v2838_v0 = vadd.f32 %v3541_v62, %v5149_v60  ;;  %v2829_v21 = vpop.f32.mrb[37].mxu0 }
 0x410   : > { %2909 = vst.msk [vmem:[%s5161_s13 + $0x8] sm:$0xff] %vm578_vm2, %v2893_v61  ;;  %v2830_v9 = vadd.f32 %v5149_v60, %v2829_v21  ;;  %v3542_v30 = vpop.f32.mrb[38].mxu0 }
 0x411   : > { %v2882_v7 = vadd.f32 %v3840_v17, %v2838_v0  ;;  %v2841_v23 = vadd.f32 %v3542_v30, %v5149_v60  ;;  %v2832_v28 = vpop.f32.mrb[39].mxu0 }
 0x412   : > { %v2880_v25 = vadd.f32 %v3841_v5, %v2830_v9  ;;  %v2833_v8 = vadd.f32 %v5149_v60, %v2832_v28 }
 0x413   : > { %v2898_v41 = vmax.f32 %v2882_v7, 0.0  ;;  %v2883_v44 = vadd.f32 %v3842_v37, %v2841_v23 }
 0x414   : > { %v2896_v33 = vmax.f32 %v2880_v25, 0.0  ;;  %v2881_v56 = vadd.f32 %v3843_v50, %v2833_v8 }
 0x415   : > { %2914 = vst.msk [vmem:[%s5161_s13 + $0x30] sm:$0xff] %vm578_vm2, %v2898_v41  ;;  %v2899_v63 = vmax.f32 %v2883_v44, 0.0 }
 0x416   : > { %2912 = vst.msk [vmem:[%s5161_s13 + $0x20] sm:$0xff] %vm578_vm2, %v2896_v33  ;;  %v2897_v11 = vmax.f32 %v2881_v56, 0.0  ;;  %v3545_v14 = vpop.f32.mrb[40].mxu0 }
 0x417   : > { %2915 = vst.msk [vmem:[%s5161_s13 + $0x38] sm:$0xff] %vm578_vm2, %v2899_v63  ;;  %v2854_v43 = vadd.f32 %v3545_v14, %v5149_v60  ;;  %v2845_v55 = vpop.f32.mrb[41].mxu0 }
 0x418   : > { %2913 = vst.msk [vmem:[%s5161_s13 + $0x28] sm:$0xff] %vm578_vm2, %v2897_v11  ;;  %v2846_v57 = vadd.f32 %v5149_v60, %v2845_v55  ;;  %v3546_v59 = vpop.f32.mrb[42].mxu0 }
 0x419   : > { %v2886_v13 = vadd.f32 %v3844_v10, %v2854_v43  ;;  %v2857_v22 = vadd.f32 %v3546_v59, %v5149_v60  ;;  %v2848_v16 = vpop.f32.mrb[43].mxu0 }
 0x41a   : > { %v2884_v15 = vadd.f32 %v3845_v39, %v2846_v57  ;;  %v2849_v6 = vadd.f32 %v5149_v60, %v2848_v16 }
 0x41b   : > { %v2902_v29 = vmax.f32 %v2886_v13, 0.0  ;;  %v2887_v47 = vadd.f32 %v3846_v19, %v2857_v22 }
 0x41c   : > { %v2900_v24 = vmax.f32 %v2884_v15, 0.0  ;;  %v2885_v12 = vadd.f32 %v3847_v4, %v2849_v6 }
 0x41d   : > { %2918 = vst.msk [vmem:[%s5161_s13 + $0x50] sm:$0xff] %vm578_vm2, %v2902_v29  ;;  %v2903_v26 = vmax.f32 %v2887_v47, 0.0 }
 0x41e   : > { %2916 = vst.msk [vmem:[%s5161_s13 + $0x40] sm:$0xff] %vm578_vm2, %v2900_v24  ;;  %v2901_v31 = vmax.f32 %v2885_v12, 0.0  ;;  %v3549_v46 = vpop.f32.mrb[44].mxu0 }
 0x41f   : > { %2919 = vst.msk [vmem:[%s5161_s13 + $0x58] sm:$0xff] %vm578_vm2, %v2903_v26  ;;  %v2870_v38 = vadd.f32 %v3549_v46, %v5149_v60  ;;  %v2861_v32 = vpop.f32.mrb[45].mxu0 }
 0x420   : > { %2917 = vst.msk [vmem:[%s5161_s13 + $0x48] sm:$0xff] %vm578_vm2, %v2901_v31  ;;  %v2862_v48 = vadd.f32 %v5149_v60, %v2861_v32  ;;  %v3550_v27 = vpop.f32.mrb[46].mxu0 }
 0x421   : > { %v2890_v42 = vadd.f32 %v3848_v40, %v2870_v38  ;;  %v2873_v36 = vadd.f32 %v3550_v27, %v5149_v60  ;;  %v2864_v53 = vpop.f32.mrb[47].mxu0 }
 0x422   : > { %v2888_v34 = vadd.f32 %v3849_v54, %v2862_v48  ;;  %v2865_v45 = vadd.f32 %v5149_v60, %v2864_v53 }
 0x423   : > { %v2906_v2 = vmax.f32 %v2890_v42, 0.0  ;;  %v2891_v51 = vadd.f32 %v3850_v49, %v2873_v36 }
 0x424   : > { %v2904_v18 = vmax.f32 %v2888_v34, 0.0  ;;  %v2889_v1 = vadd.f32 %v3851_v20, %v2865_v45 }
 0x425   : > { %2922 = vst.msk [vmem:[%s5161_s13 + $0x70] sm:$0xff] %vm578_vm2, %v2906_v2  ;;  %v2907_v52 = vmax.f32 %v2891_v51, 0.0 }
 0x426   : > { %2920 = vst.msk [vmem:[%s5161_s13 + $0x60] sm:$0xff] %vm578_vm2, %v2904_v18  ;;  %v2905_v60 = vmax.f32 %v2889_v1, 0.0 }
 0x427   : > { %2923 = vst.msk [vmem:[%s5161_s13 + $0x78] sm:$0xff] %vm578_vm2, %v2907_v52 }
 0x428   : > { %2921 = vst.msk [vmem:[%s5161_s13 + $0x68] sm:$0xff] %vm578_vm2, %v2905_v60 }
 0x429   : > { %3955 = shalt.err (!%p3952_p1)
}
 0x42a   : > { %s3956_s29 = scalar_lea.hbm %s5223_s21, 2048  ;;  %s3960_s26 = scalar_lea.hbm %s5407_s9, 8192 }
 0x42b   : > { %p3957_p5 = scmp.ne.s32.totalorder %s5223_s21, %s3956_s29  ;;  %p3961_p10 = scmp.lt.u32.totalorder %s5223_s21, %s5407_s9 }
 0x42c   : > { %p3962_p3 = scmp.lt.u32.totalorder %s3960_s26, %s3956_s29  ;;  %p3964_p7 = scmp.lt.u32.totalorder %s3956_s29, %s5223_s21 }
 0x42d   : > { %p3958_p8 = pnand %p3957_p5, %p5408_p6 }
 0x42e   : > { %p3963_p9 = por %p3962_p3, %p3961_p10 }
 0x42f   : > { %p3959_p13 = pneg %p3958_p8 }
 0x430   : > { %p3965_p4 = por %p3964_p7, %p3963_p9 }
 0x432   : > { %p3966_p0 = pnand %p3965_p4, %p3959_p13 }
 0x434   : > { %3969 = shalt.err (!%p3966_p0)
}
 0x435   : > { %s4106_s28 = smov 128   ;;  %s4107_s23 = smov 8  }
 0x436   : > { %3698 = dma.vmem_to_hbm [thread:$0]  (%p5408_p6), %s5216_s6, 2048, %s5223_s21, %s2925_s25, %s4106_s28, %s4106_s28, %s4107_s23  }
 0x437 PF: > { %p3715_p12 = scmp.ge.s32.totalorder %s4096_s22, 2  ;;  %s2956_s5 = sand.u32 1, %s4068_s15  }
 0x438   : > { %p5409_p11 = scmp.ne.s32.totalorder %s5375_s27, 0  ;;  %s2957_s12 = scalar_lea.sflag [#allocation5], %s2956_s5 }
 0x43a   : > { %p3711_p2 = pnand %p3715_p12, %p5409_p11 }
 0x43c   : > { %4039 = dma.done.wait (!%p3711_p2), %s2957_s12, 2048  }
 0x43d   : > { %4041 = vsyncadd (!%p3711_p2), %s2957_s12, 4294965248  ;;  %s28_s22 = sadd.s32 1, %s4096_s22   ;;  %s5411_s12 = sld [smem:[#allocation14_spill]] }
 0x43e   : > { %p5258_p1 = scmp.ge.s32.totalorder %s28_s22, 6   ;;  %s5412_s8 = sld [smem:[#allocation24_spill]] }
 0x43f   : > { %s5413_s7 = sld [smem:[#allocation15_spill]]  ;;  %s5414_s17 = sld [smem:[#allocation25_spill]] }
 0x440   : > { %s5415_s18 = sld [smem:[#allocation18_spill]]  ;;  %s5416_s19 = sld [smem:[#allocation19_spill]] }
 0x441   : > { %s5417_s20 = sld [smem:[#allocation20_spill]]  ;;  %s5418_s21 = sld [smem:[#allocation21_spill]] }
 0x442   : > { %s5420_s30 = smov %s4048_s10  ;;  %s5421_s10 = smov %s4052_s11 }
 0x443   : > { %s5422_s11 = smov %s4449_s1  ;;  %s5423_s13 = smov %s4064_s14 }
 0x444   : > { %s5424_s14 = smov %s5412_s8  ;;  %s5425_s15 = smov %s4072_s16 }
 0x445   : > { %s5426_s16 = smov %s5413_s7  ;;  %27 = sbr.rel (!%p5258_p1) target bundleno = 23 (0x17), region = 136 }
 0x44c   :  { %2962 = vsyncpa [#allocation4], 1 }
 0x44d   :  { %2964 = vsyncpa [#allocation4 + $0x1], 1 }
 0x44e   :  { %2965 = vsyncpa [#allocation7], 1 }
 0x44f   :  { %2967 = vsyncpa [#allocation7 + $0x1], 1 }
 0x450   :  { %2968 = vsyncpa [#allocation5], 1 }
 0x451   :  { %2970 = vsyncpa [#allocation5 + $0x1], 1 }

</bundles_post_ra>
